<compile_context>
chip_gen: v7x
topology: tpu7x:2x2x1
jax: 0.10.0
libtpu: 0.0.40
codegen_flags: <defaults>
</compile_context>

<pallas_src>
import functools

import numpy as np
import jax
import jax.numpy as jnp
from jax.experimental import pallas as pl
from jax.experimental.pallas import tpu as pltpu

EPS = 1e-5


# ------------------------------ fused kernel --------------------------------
def _fused_kernel(x_ref, o_ref, *, cin, cmid, cout, H, W, NW, w1, b1, b2, filters):
    # x_ref : (cin, H, NW) f32   -- batch packed along lanes, NW = N*W
    # o_ref : (H, cout*NW) f32   -- lane-dense output slab
    # w1    : numpy (cmid, cin, 3, 3) conv weights with BN1 scale folded in
    # b1    : list[float] folded conv bias + BN1 shift
    # b2    : list[float] folded BN2 shift
    # filters: per output channel (c, [(dy, wy)...], [(dx, wx_scaled)...]) with
    #          BN2 scale and box area folded into the column weights.
    col = jax.lax.broadcasted_iota(jnp.int32, (H, NW), 1) % W  # per-image column

    def shift_rows(a, dy):
        # b[i, :] = a[i + dy, :], zero outside [0, H)
        if dy == 0:
            return a
        if dy > 0:
            return jnp.concatenate(
                [a[dy:, :], jnp.zeros((dy, NW), jnp.float32)], axis=0)
        return jnp.concatenate(
            [jnp.zeros((-dy, NW), jnp.float32), a[:dy, :]], axis=0)

    def shift_cols(a, dx):
        # b[i, n*W + j] = a[i, n*W + j + dx], zero outside each image's [0, W)
        if dx == 0:
            return a
        if dx > 0:
            s = jnp.concatenate(
                [a[:, dx:], jnp.zeros((H, dx), jnp.float32)], axis=1)
        else:
            s = jnp.concatenate(
                [jnp.zeros((H, -dx), jnp.float32), a[:, :dx]], axis=1)
        valid = jnp.logical_and(col + dx >= 0, col + dx < W)
        return jnp.where(valid, s, 0.0)

    # ---- stage 1: 3x3 conv (BN1 scale pre-folded into weights) + bias + ReLU ----
    acc1 = [jnp.zeros((H, NW), jnp.float32) for _ in range(cmid)]
    for ci in range(cin):
        xc = x_ref[ci]                       # (H, NW)
        for ky in range(3):
            xr = shift_rows(xc, ky - 1)      # hoisted: shared across kx and co
            for kx in range(3):
                win = shift_cols(xr, kx - 1)
                for co in range(cmid):
                    wgt = float(w1[co, ci, ky, kx])
                    if wgt != 0.0:
                        acc1[co] = acc1[co] + win * wgt
    f1 = [jnp.maximum(acc1[co] + float(b1[co]), 0.0) for co in range(cmid)]

    # ---- stage 2: BoxConv (separable row/col passes, BN2 folded) + bias + ReLU ----
    # TODO(synk): verify in_plane-major output-channel order vs PyTorch BoxConv2d.
    rowcache = {}                            # (c, dy) -> row-shifted f1[c]
    outs = []
    for oc in range(cout):
        c, wys, wxs = filters[oc]
        ry = jnp.zeros((H, NW), jnp.float32)
        for dy, wy in wys:
            key = (c, dy)
            if key not in rowcache:
                rowcache[key] = shift_rows(f1[c], dy)
            ry = ry + rowcache[key] * float(wy)
        acc = jnp.zeros((H, NW), jnp.float32)
        for dx, wx in wxs:
            acc = acc + shift_cols(ry, dx) * float(wx)
        outs.append(jnp.maximum(acc + float(b2[oc]), 0.0))

    # one wide unmasked store: (H, cout*NW) == (16, 128) at the demo sizes
    o_ref[...] = jnp.concatenate(outs, axis=-1)


def feature_sampling_forward(x, w1, b1, b2, filters):
    N, Cin, H, W = x.shape
    Cmid = len(b1)
    Cout = len(b2)
    NW = N * W
    # layout plumbing only: NCHW -> (Cin, H, N*W), batch packed along lanes
    xp = jnp.transpose(x, (1, 2, 0, 3)).reshape(Cin, H, NW)
    kern = functools.partial(
        _fused_kernel, cin=Cin, cmid=Cmid, cout=Cout, H=H, W=W, NW=NW,
        w1=w1, b1=b1, b2=b2, filters=filters)
    out = pl.pallas_call(
        kern,
        out_shape=jax.ShapeDtypeStruct((H, Cout * NW), jnp.float32),
        in_specs=[pl.BlockSpec(memory_space=pltpu.MemorySpace.VMEM)],
        out_specs=pl.BlockSpec(memory_space=pltpu.MemorySpace.VMEM),
    )(xp)
    # layout plumbing only: lane-dense (H, Cout*N*W) -> NCHW
    return jnp.transpose(out.reshape(H, Cout, N, W), (2, 1, 0, 3))


# -------------------------- box-filter weight prep --------------------------
def _interval_weights(lo, hi):
    """Integer cells [k, k+1) overlapping [lo, hi + 1) with their overlap length."""
    hi1 = hi + 1.0
    k0 = int(np.floor(lo))
    k1 = int(np.ceil(hi1)) - 1
    out = []
    for k in range(k0, k1 + 1):
        w = min(k + 1.0, hi1) - max(float(k), lo)
        if w > 1e-9:
            out.append((k, float(w)))
    return out


def _box_filters(x_min, x_max, y_min, y_max, normalize=True):
    # TODO(synk): box coordinates are baked as trace-time constants; the real
    #             BoxConv2d treats x_min/x_max/y_min/y_max as learnable, dynamic
    #             tensors (reparametrized) and handles them without retracing.
    cmid, nfilt = x_min.shape
    filters = []
    for c in range(cmid):
        for f in range(nfilt):
            wys = _interval_weights(float(y_min[c, f]), float(y_max[c, f]))
            wxs = _interval_weights(float(x_min[c, f]), float(x_max[c, f]))
            area = ((float(y_max[c, f]) - float(y_min[c, f]) + 1.0)
                    * (float(x_max[c, f]) - float(x_min[c, f]) + 1.0)) if normalize else 1.0
            filters.append((c, wys, wxs, area))
    return filters


def _fold_params(w_conv, b_conv, g1, be1, m1, v1, filters, g2, be2, m2, v2, H, W):
    """Fold inference-mode BN into conv weights / box filter weights (trace time)."""
    s1 = np.asarray(g1, np.float64) / np.sqrt(np.asarray(v1, np.float64) + EPS)
    b1 = ((np.asarray(b_conv, np.float64) - np.asarray(m1, np.float64)) * s1
          + np.asarray(be1, np.float64))
    w1 = np.asarray(w_conv, np.float64) * s1[:, None, None, None]
    s2 = np.asarray(g2, np.float64) / np.sqrt(np.asarray(v2, np.float64) + EPS)
    b2 = np.asarray(be2, np.float64) - np.asarray(m2, np.float64) * s2
    kfilters = []
    for oc, (c, wys, wxs, area) in enumerate(filters):
        scale = float(s2[oc]) / area
        wys_k = [(int(dy), float(wy)) for dy, wy in wys if abs(dy) < H]
        wxs_k = [(int(dx), float(wx) * scale) for dx, wx in wxs if abs(dx) < W]
        kfilters.append((c, wys_k, wxs_k))
    return w1, [float(v) for v in b1], [float(v) for v in b2], kfilters


# ------------------------------ JAX reference --------------------------------
def reference_forward(x, w_conv, b_conv, g1, be1, m1, v1, filters, g2, be2, m2, v2):
    y = jax.lax.conv_general_dilated(
        x, w_conv, window_strides=(1, 1), padding="SAME",
        dimension_numbers=("NCHW", "OIHW", "NCHW"),
        precision=jax.lax.Precision.HIGHEST)
    y = y + b_conv[None, :, None, None]
    y = (y - m1[None, :, None, None]) / jnp.sqrt(v1[None, :, None, None] + EPS) \
        * g1[None, :, None, None] + be1[None, :, None, None]
    y = jnp.maximum(y, 0.0)
    N, Cmid, H, W = y.shape
    all_dy = [dy for (_, wys, _, _) in filters for dy, _ in wys]
    all_dx = [dx for (_, _, wxs, _) in filters for dx, _ in wxs]
    pt = max(0, -min(all_dy)); pb = max(0, max(all_dy))
    pleft = max(0, -min(all_dx)); pr = max(0, max(all_dx))
    yp = jnp.pad(y, ((0, 0), (0, 0), (pt, pb), (pleft, pr)))
    chans = []
    for (c, wys, wxs, area) in filters:
        acc = jnp.zeros((N, H, W), jnp.float32)
        for dy, wy in wys:
            for dx, wx in wxs:
                acc = acc + yp[:, c, pt + dy:pt + dy + H,
                               pleft + dx:pleft + dx + W] * (wy * wx / area)
        chans.append(acc)
    z = jnp.stack(chans, axis=1)
    z = (z - m2[None, :, None, None]) / jnp.sqrt(v2[None, :, None, None] + EPS) \
        * g2[None, :, None, None] + be2[None, :, None, None]
    return jnp.maximum(z, 0.0)


if __name__ == "__main__":
    key = jax.random.PRNGKey(0)
    N, Cin, H, W = 2, 4, 16, 16          # x: (N, in_channels, H, W), NCHW
    Cout = 4                              # out_channels
    Cmid = max(Cin // 4, 1)               # intermediate_channels
    nfilt = Cout // Cmid                  # num_box_filters

    ks = jax.random.split(key, 12)
    x = jax.random.normal(ks[0], (N, Cin, H, W), jnp.float32)

    # Conv2d(in, mid, 3, padding=1) parameters
    w_conv = jax.random.normal(ks[1], (Cmid, Cin, 3, 3), jnp.float32) * np.sqrt(2.0 / (Cin * 9))
    b_conv = 0.05 * jax.random.normal(ks[2], (Cmid,), jnp.float32)

    # BatchNorm2d(Cmid) -- inference mode (folded affine).
    # TODO(synk): training-mode batch statistics are not computed.
    g1 = 1.0 + 0.1 * jax.random.normal(ks[3], (Cmid,), jnp.float32)
    be1 = 0.1 * jax.random.normal(ks[4], (Cmid,), jnp.float32)
    m1 = 0.1 * jax.random.normal(ks[5], (Cmid,), jnp.float32)
    v1 = 1.0 + 0.1 * jax.random.uniform(ks[6], (Cmid,), jnp.float32)

    # BoxConv2d(Cmid, nfilt, 16, 16) box parameters (deterministic, concrete)
    cy = jax.random.uniform(ks[7], (Cmid, nfilt), minval=-2.0, maxval=2.0)
    cx = jax.random.uniform(ks[8], (Cmid, nfilt), minval=-2.0, maxval=2.0)
    hh = jax.random.uniform(ks[9], (Cmid, nfilt), minval=0.6, maxval=2.2)
    hw = jax.random.uniform(ks[10], (Cmid, nfilt), minval=0.6, maxval=2.2)
    y_min = np.asarray(cy - hh); y_max = np.asarray(cy + hh)
    x_min = np.asarray(cx - hw); x_max = np.asarray(cx + hw)
    filters = _box_filters(x_min, x_max, y_min, y_max, normalize=True)

    # BatchNorm2d(Cout) -- inference mode (folded affine)
    k2 = jax.random.split(ks[11], 4)
    g2 = 1.0 + 0.1 * jax.random.normal(k2[0], (Cout,), jnp.float32)
    be2 = 0.1 * jax.random.normal(k2[1], (Cout,), jnp.float32)
    m2 = 0.1 * jax.random.normal(k2[2], (Cout,), jnp.float32)
    v2 = 1.0 + 0.1 * jax.random.uniform(k2[3], (Cout,), jnp.float32)

    # Fold BN into weights / biases at trace time (pure constant folding).
    w1_f, b1_f, b2_f, kfilters = _fold_params(
        np.asarray(w_conv), np.asarray(b_conv), np.asarray(g1), np.asarray(be1),
        np.asarray(m1), np.asarray(v1), filters,
        np.asarray(g2), np.asarray(be2), np.asarray(m2), np.asarray(v2), H, W)

    out = feature_sampling_forward(x, w1_f, b1_f, b2_f, kfilters)
    out = jax.block_until_ready(out)
    assert out.shape == (N, Cout, H, W), out.shape

    ref = reference_forward(x, w_conv, b_conv, g1, be1, m1, v1,
                            filters, g2, be2, m2, v2)
    ref = jax.block_until_ready(ref)

    if not np.allclose(np.asarray(out), np.asarray(ref), atol=2e-4, rtol=2e-4):
        raise AssertionError("Pallas kernel output does not match JAX reference")
    print("KERNEL_OK")
</pallas_src>

<mosaic_0001>
module attributes {stable_mosaic.version = 11 : i64} {
  func.func @_fused_kernel(%arg0: memref<4x16x32xf32, #tpu.memory_space<vmem>>, %arg1: memref<16x128xf32, #tpu.memory_space<vmem>>) attributes {dimension_semantics = [], scalar_prefetch = 0 : i64, scratch_operands = 0 : i64, tpu.core_type = #tpu.core_type<tc>} {
    %0 = tpu.iota {dimensions = array<i32: 1>} : vector<16x32xi32>
    %c16_i32 = arith.constant 16 : i32
    %c0_i32 = arith.constant 0 : i32
    %1 = arith.cmpi eq, %c16_i32, %c0_i32 : i32
    %c1_i32 = arith.constant 1 : i32
    %2 = arith.select %1, %c1_i32, %c16_i32 : i32
    %3 = vector.broadcast %2 : i32 to vector<16x32xi32>
    %4 = arith.remsi %0, %3 : vector<16x32xi32>
    %c0_i32_0 = arith.constant 0 : i32
    %5 = vector.broadcast %c0_i32_0 : i32 to vector<16x32xi32>
    %6 = arith.cmpi ne, %4, %5 : vector<16x32xi32>
    %c0_i32_1 = arith.constant 0 : i32
    %7 = vector.broadcast %c0_i32_1 : i32 to vector<16x32xi32>
    %8 = arith.cmpi slt, %4, %7 : vector<16x32xi32>
    %c0_i32_2 = arith.constant 0 : i32
    %9 = arith.cmpi slt, %2, %c0_i32_2 : i32
    %10 = vector.broadcast %9 : i1 to vector<16x32xi1>
    %11 = vector.broadcast %10 : vector<16x32xi1> to vector<16x32xi1>
    %12 = arith.xori %8, %11 : vector<16x32xi1>
    %13 = arith.andi %12, %6 : vector<16x32xi1>
    %14 = vector.broadcast %2 : i32 to vector<16x32xi32>
    %15 = arith.addi %4, %14 : vector<16x32xi32>
    %16 = arith.select %13, %15, %4 : vector<16x32xi1>, vector<16x32xi32>
    %cst = arith.constant 0.000000e+00 : f32
    %17 = vector.broadcast %cst : f32 to vector<16x32xf32>
    %c0 = arith.constant 0 : index
    %c0_3 = arith.constant 0 : index
    %c0_4 = arith.constant 0 : index
    %18 = vector.load %arg0[%c0, %c0_3, %c0_4] : memref<4x16x32xf32, #tpu.memory_space<vmem>>, vector<1x16x32xf32>
    %19 = vector.shape_cast %18 : vector<1x16x32xf32> to vector<16x32xf32>
    %cst_5 = arith.constant 0.000000e+00 : f32
    %20 = vector.broadcast %cst_5 : f32 to vector<1x32xf32>
    %21 = vector.extract_strided_slice %19 {offsets = [0, 0], sizes = [15, 32], strides = [1, 1]} : vector<16x32xf32> to vector<15x32xf32>
    %22 = tpu.concatenate %20, %21 in 0 : vector<1x32xf32>, vector<15x32xf32> -> vector<16x32xf32>
    %cst_6 = arith.constant 0.000000e+00 : f32
    %23 = vector.broadcast %cst_6 : f32 to vector<16x1xf32>
    %24 = vector.extract_strided_slice %22 {offsets = [0, 0], sizes = [16, 31], strides = [1, 1]} : vector<16x32xf32> to vector<16x31xf32>
    %25 = tpu.concatenate %23, %24 in 1 : vector<16x1xf32>, vector<16x31xf32> -> vector<16x32xf32>
    %c-1_i32 = arith.constant -1 : i32
    %26 = vector.broadcast %c-1_i32 : i32 to vector<16x32xi32>
    %27 = arith.addi %16, %26 : vector<16x32xi32>
    %c0_i32_7 = arith.constant 0 : i32
    %28 = vector.broadcast %c0_i32_7 : i32 to vector<16x32xi32>
    %29 = arith.cmpi sge, %27, %28 : vector<16x32xi32>
    %c-1_i32_8 = arith.constant -1 : i32
    %30 = vector.broadcast %c-1_i32_8 : i32 to vector<16x32xi32>
    %31 = arith.addi %16, %30 : vector<16x32xi32>
    %c16_i32_9 = arith.constant 16 : i32
    %32 = vector.broadcast %c16_i32_9 : i32 to vector<16x32xi32>
    %33 = arith.cmpi slt, %31, %32 : vector<16x32xi32>
    %34 = arith.andi %29, %33 : vector<16x32xi1>
    %cst_10 = arith.constant 0.000000e+00 : f32
    %35 = vector.broadcast %cst_10 : f32 to vector<16x32xf32>
    %36 = arith.select %34, %25, %35 : vector<16x32xi1>, vector<16x32xf32>
    %cst_11 = arith.constant -0.517646194 : f32
    %37 = vector.broadcast %cst_11 : f32 to vector<16x32xf32>
    %38 = arith.mulf %36, %37 : vector<16x32xf32>
    %39 = arith.addf %17, %38 : vector<16x32xf32>
    %cst_12 = arith.constant -0.431435555 : f32
    %40 = vector.broadcast %cst_12 : f32 to vector<16x32xf32>
    %41 = arith.mulf %22, %40 : vector<16x32xf32>
    %42 = arith.addf %39, %41 : vector<16x32xf32>
    %43 = vector.extract_strided_slice %22 {offsets = [0, 1], sizes = [16, 31], strides = [1, 1]} : vector<16x32xf32> to vector<16x31xf32>
    %cst_13 = arith.constant 0.000000e+00 : f32
    %44 = vector.broadcast %cst_13 : f32 to vector<16x1xf32>
    %45 = tpu.concatenate %43, %44 in 1 : vector<16x31xf32>, vector<16x1xf32> -> vector<16x32xf32>
    %c1_i32_14 = arith.constant 1 : i32
    %46 = vector.broadcast %c1_i32_14 : i32 to vector<16x32xi32>
    %47 = arith.addi %16, %46 : vector<16x32xi32>
    %c0_i32_15 = arith.constant 0 : i32
    %48 = vector.broadcast %c0_i32_15 : i32 to vector<16x32xi32>
    %49 = arith.cmpi sge, %47, %48 : vector<16x32xi32>
    %c1_i32_16 = arith.constant 1 : i32
    %50 = vector.broadcast %c1_i32_16 : i32 to vector<16x32xi32>
    %51 = arith.addi %16, %50 : vector<16x32xi32>
    %c16_i32_17 = arith.constant 16 : i32
    %52 = vector.broadcast %c16_i32_17 : i32 to vector<16x32xi32>
    %53 = arith.cmpi slt, %51, %52 : vector<16x32xi32>
    %54 = arith.andi %49, %53 : vector<16x32xi1>
    %cst_18 = arith.constant 0.000000e+00 : f32
    %55 = vector.broadcast %cst_18 : f32 to vector<16x32xf32>
    %56 = arith.select %54, %45, %55 : vector<16x32xi1>, vector<16x32xf32>
    %cst_19 = arith.constant 0.0435623825 : f32
    %57 = vector.broadcast %cst_19 : f32 to vector<16x32xf32>
    %58 = arith.mulf %56, %57 : vector<16x32xf32>
    %59 = arith.addf %42, %58 : vector<16x32xf32>
    %cst_20 = arith.constant 0.000000e+00 : f32
    %60 = vector.broadcast %cst_20 : f32 to vector<16x1xf32>
    %61 = vector.extract_strided_slice %19 {offsets = [0, 0], sizes = [16, 31], strides = [1, 1]} : vector<16x32xf32> to vector<16x31xf32>
    %62 = tpu.concatenate %60, %61 in 1 : vector<16x1xf32>, vector<16x31xf32> -> vector<16x32xf32>
    %c-1_i32_21 = arith.constant -1 : i32
    %63 = vector.broadcast %c-1_i32_21 : i32 to vector<16x32xi32>
    %64 = arith.addi %16, %63 : vector<16x32xi32>
    %c0_i32_22 = arith.constant 0 : i32
    %65 = vector.broadcast %c0_i32_22 : i32 to vector<16x32xi32>
    %66 = arith.cmpi sge, %64, %65 : vector<16x32xi32>
    %c-1_i32_23 = arith.constant -1 : i32
    %67 = vector.broadcast %c-1_i32_23 : i32 to vector<16x32xi32>
    %68 = arith.addi %16, %67 : vector<16x32xi32>
    %c16_i32_24 = arith.constant 16 : i32
    %69 = vector.broadcast %c16_i32_24 : i32 to vector<16x32xi32>
    %70 = arith.cmpi slt, %68, %69 : vector<16x32xi32>
    %71 = arith.andi %66, %70 : vector<16x32xi1>
    %cst_25 = arith.constant 0.000000e+00 : f32
    %72 = vector.broadcast %cst_25 : f32 to vector<16x32xf32>
    %73 = arith.select %71, %62, %72 : vector<16x32xi1>, vector<16x32xf32>
    %cst_26 = arith.constant -0.0749302879 : f32
    %74 = vector.broadcast %cst_26 : f32 to vector<16x32xf32>
    %75 = arith.mulf %73, %74 : vector<16x32xf32>
    %76 = arith.addf %59, %75 : vector<16x32xf32>
    %cst_27 = arith.constant -0.161490321 : f32
    %77 = vector.broadcast %cst_27 : f32 to vector<16x32xf32>
    %78 = arith.mulf %19, %77 : vector<16x32xf32>
    %79 = arith.addf %76, %78 : vector<16x32xf32>
    %80 = vector.extract_strided_slice %19 {offsets = [0, 1], sizes = [16, 31], strides = [1, 1]} : vector<16x32xf32> to vector<16x31xf32>
    %cst_28 = arith.constant 0.000000e+00 : f32
    %81 = vector.broadcast %cst_28 : f32 to vector<16x1xf32>
    %82 = tpu.concatenate %80, %81 in 1 : vector<16x31xf32>, vector<16x1xf32> -> vector<16x32xf32>
    %c1_i32_29 = arith.constant 1 : i32
    %83 = vector.broadcast %c1_i32_29 : i32 to vector<16x32xi32>
    %84 = arith.addi %16, %83 : vector<16x32xi32>
    %c0_i32_30 = arith.constant 0 : i32
    %85 = vector.broadcast %c0_i32_30 : i32 to vector<16x32xi32>
    %86 = arith.cmpi sge, %84, %85 : vector<16x32xi32>
    %c1_i32_31 = arith.constant 1 : i32
    %87 = vector.broadcast %c1_i32_31 : i32 to vector<16x32xi32>
    %88 = arith.addi %16, %87 : vector<16x32xi32>
    %c16_i32_32 = arith.constant 16 : i32
    %89 = vector.broadcast %c16_i32_32 : i32 to vector<16x32xi32>
    %90 = arith.cmpi slt, %88, %89 : vector<16x32xi32>
    %91 = arith.andi %86, %90 : vector<16x32xi1>
    %cst_33 = arith.constant 0.000000e+00 : f32
    %92 = vector.broadcast %cst_33 : f32 to vector<16x32xf32>
    %93 = arith.select %91, %82, %92 : vector<16x32xi1>, vector<16x32xf32>
    %cst_34 = arith.constant -0.249778479 : f32
    %94 = vector.broadcast %cst_34 : f32 to vector<16x32xf32>
    %95 = arith.mulf %93, %94 : vector<16x32xf32>
    %96 = arith.addf %79, %95 : vector<16x32xf32>
    %97 = vector.extract_strided_slice %19 {offsets = [1, 0], sizes = [15, 32], strides = [1, 1]} : vector<16x32xf32> to vector<15x32xf32>
    %cst_35 = arith.constant 0.000000e+00 : f32
    %98 = vector.broadcast %cst_35 : f32 to vector<1x32xf32>
    %99 = tpu.concatenate %97, %98 in 0 : vector<15x32xf32>, vector<1x32xf32> -> vector<16x32xf32>
    %cst_36 = arith.constant 0.000000e+00 : f32
    %100 = vector.broadcast %cst_36 : f32 to vector<16x1xf32>
    %101 = vector.extract_strided_slice %99 {offsets = [0, 0], sizes = [16, 31], strides = [1, 1]} : vector<16x32xf32> to vector<16x31xf32>
    %102 = tpu.concatenate %100, %101 in 1 : vector<16x1xf32>, vector<16x31xf32> -> vector<16x32xf32>
    %c-1_i32_37 = arith.constant -1 : i32
    %103 = vector.broadcast %c-1_i32_37 : i32 to vector<16x32xi32>
    %104 = arith.addi %16, %103 : vector<16x32xi32>
    %c0_i32_38 = arith.constant 0 : i32
    %105 = vector.broadcast %c0_i32_38 : i32 to vector<16x32xi32>
    %106 = arith.cmpi sge, %104, %105 : vector<16x32xi32>
    %c-1_i32_39 = arith.constant -1 : i32
    %107 = vector.broadcast %c-1_i32_39 : i32 to vector<16x32xi32>
    %108 = arith.addi %16, %107 : vector<16x32xi32>
    %c16_i32_40 = arith.constant 16 : i32
    %109 = vector.broadcast %c16_i32_40 : i32 to vector<16x32xi32>
    %110 = arith.cmpi slt, %108, %109 : vector<16x32xi32>
    %111 = arith.andi %106, %110 : vector<16x32xi1>
    %cst_41 = arith.constant 0.000000e+00 : f32
    %112 = vector.broadcast %cst_41 : f32 to vector<16x32xf32>
    %113 = arith.select %111, %102, %112 : vector<16x32xi1>, vector<16x32xf32>
    %cst_42 = arith.constant -0.243349969 : f32
    %114 = vector.broadcast %cst_42 : f32 to vector<16x32xf32>
    %115 = arith.mulf %113, %114 : vector<16x32xf32>
    %116 = arith.addf %96, %115 : vector<16x32xf32>
    %cst_43 = arith.constant 0.0629803613 : f32
    %117 = vector.broadcast %cst_43 : f32 to vector<16x32xf32>
    %118 = arith.mulf %99, %117 : vector<16x32xf32>
    %119 = arith.addf %116, %118 : vector<16x32xf32>
    %120 = vector.extract_strided_slice %99 {offsets = [0, 1], sizes = [16, 31], strides = [1, 1]} : vector<16x32xf32> to vector<16x31xf32>
    %cst_44 = arith.constant 0.000000e+00 : f32
    %121 = vector.broadcast %cst_44 : f32 to vector<16x1xf32>
    %122 = tpu.concatenate %120, %121 in 1 : vector<16x31xf32>, vector<16x1xf32> -> vector<16x32xf32>
    %c1_i32_45 = arith.constant 1 : i32
    %123 = vector.broadcast %c1_i32_45 : i32 to vector<16x32xi32>
    %124 = arith.addi %16, %123 : vector<16x32xi32>
    %c0_i32_46 = arith.constant 0 : i32
    %125 = vector.broadcast %c0_i32_46 : i32 to vector<16x32xi32>
    %126 = arith.cmpi sge, %124, %125 : vector<16x32xi32>
    %c1_i32_47 = arith.constant 1 : i32
    %127 = vector.broadcast %c1_i32_47 : i32 to vector<16x32xi32>
    %128 = arith.addi %16, %127 : vector<16x32xi32>
    %c16_i32_48 = arith.constant 16 : i32
    %129 = vector.broadcast %c16_i32_48 : i32 to vector<16x32xi32>
    %130 = arith.cmpi slt, %128, %129 : vector<16x32xi32>
    %131 = arith.andi %126, %130 : vector<16x32xi1>
    %cst_49 = arith.constant 0.000000e+00 : f32
    %132 = vector.broadcast %cst_49 : f32 to vector<16x32xf32>
    %133 = arith.select %131, %122, %132 : vector<16x32xi1>, vector<16x32xf32>
    %cst_50 = arith.constant -0.27775076 : f32
    %134 = vector.broadcast %cst_50 : f32 to vector<16x32xf32>
    %135 = arith.mulf %133, %134 : vector<16x32xf32>
    %136 = arith.addf %119, %135 : vector<16x32xf32>
    %c1 = arith.constant 1 : index
    %c0_51 = arith.constant 0 : index
    %c0_52 = arith.constant 0 : index
    %137 = vector.load %arg0[%c1, %c0_51, %c0_52] : memref<4x16x32xf32, #tpu.memory_space<vmem>>, vector<1x16x32xf32>
    %138 = vector.shape_cast %137 : vector<1x16x32xf32> to vector<16x32xf32>
    %cst_53 = arith.constant 0.000000e+00 : f32
    %139 = vector.broadcast %cst_53 : f32 to vector<1x32xf32>
    %140 = vector.extract_strided_slice %138 {offsets = [0, 0], sizes = [15, 32], strides = [1, 1]} : vector<16x32xf32> to vector<15x32xf32>
    %141 = tpu.concatenate %139, %140 in 0 : vector<1x32xf32>, vector<15x32xf32> -> vector<16x32xf32>
    %cst_54 = arith.constant 0.000000e+00 : f32
    %142 = vector.broadcast %cst_54 : f32 to vector<16x1xf32>
    %143 = vector.extract_strided_slice %141 {offsets = [0, 0], sizes = [16, 31], strides = [1, 1]} : vector<16x32xf32> to vector<16x31xf32>
    %144 = tpu.concatenate %142, %143 in 1 : vector<16x1xf32>, vector<16x31xf32> -> vector<16x32xf32>
    %c-1_i32_55 = arith.constant -1 : i32
    %145 = vector.broadcast %c-1_i32_55 : i32 to vector<16x32xi32>
    %146 = arith.addi %16, %145 : vector<16x32xi32>
    %c0_i32_56 = arith.constant 0 : i32
    %147 = vector.broadcast %c0_i32_56 : i32 to vector<16x32xi32>
    %148 = arith.cmpi sge, %146, %147 : vector<16x32xi32>
    %c-1_i32_57 = arith.constant -1 : i32
    %149 = vector.broadcast %c-1_i32_57 : i32 to vector<16x32xi32>
    %150 = arith.addi %16, %149 : vector<16x32xi32>
    %c16_i32_58 = arith.constant 16 : i32
    %151 = vector.broadcast %c16_i32_58 : i32 to vector<16x32xi32>
    %152 = arith.cmpi slt, %150, %151 : vector<16x32xi32>
    %153 = arith.andi %148, %152 : vector<16x32xi1>
    %cst_59 = arith.constant 0.000000e+00 : f32
    %154 = vector.broadcast %cst_59 : f32 to vector<16x32xf32>
    %155 = arith.select %153, %144, %154 : vector<16x32xi1>, vector<16x32xf32>
    %cst_60 = arith.constant 0.451468259 : f32
    %156 = vector.broadcast %cst_60 : f32 to vector<16x32xf32>
    %157 = arith.mulf %155, %156 : vector<16x32xf32>
    %158 = arith.addf %136, %157 : vector<16x32xf32>
    %cst_61 = arith.constant -0.0401773527 : f32
    %159 = vector.broadcast %cst_61 : f32 to vector<16x32xf32>
    %160 = arith.mulf %141, %159 : vector<16x32xf32>
    %161 = arith.addf %158, %160 : vector<16x32xf32>
    %162 = vector.extract_strided_slice %141 {offsets = [0, 1], sizes = [16, 31], strides = [1, 1]} : vector<16x32xf32> to vector<16x31xf32>
    %cst_62 = arith.constant 0.000000e+00 : f32
    %163 = vector.broadcast %cst_62 : f32 to vector<16x1xf32>
    %164 = tpu.concatenate %162, %163 in 1 : vector<16x31xf32>, vector<16x1xf32> -> vector<16x32xf32>
    %c1_i32_63 = arith.constant 1 : i32
    %165 = vector.broadcast %c1_i32_63 : i32 to vector<16x32xi32>
    %166 = arith.addi %16, %165 : vector<16x32xi32>
    %c0_i32_64 = arith.constant 0 : i32
    %167 = vector.broadcast %c0_i32_64 : i32 to vector<16x32xi32>
    %168 = arith.cmpi sge, %166, %167 : vector<16x32xi32>
    %c1_i32_65 = arith.constant 1 : i32
    %169 = vector.broadcast %c1_i32_65 : i32 to vector<16x32xi32>
    %170 = arith.addi %16, %169 : vector<16x32xi32>
    %c16_i32_66 = arith.constant 16 : i32
    %171 = vector.broadcast %c16_i32_66 : i32 to vector<16x32xi32>
    %172 = arith.cmpi slt, %170, %171 : vector<16x32xi32>
    %173 = arith.andi %168, %172 : vector<16x32xi1>
    %cst_67 = arith.constant 0.000000e+00 : f32
    %174 = vector.broadcast %cst_67 : f32 to vector<16x32xf32>
    %175 = arith.select %173, %164, %174 : vector<16x32xi1>, vector<16x32xf32>
    %cst_68 = arith.constant 0.204309627 : f32
    %176 = vector.broadcast %cst_68 : f32 to vector<16x32xf32>
    %177 = arith.mulf %175, %176 : vector<16x32xf32>
    %178 = arith.addf %161, %177 : vector<16x32xf32>
    %cst_69 = arith.constant 0.000000e+00 : f32
    %179 = vector.broadcast %cst_69 : f32 to vector<16x1xf32>
    %180 = vector.extract_strided_slice %138 {offsets = [0, 0], sizes = [16, 31], strides = [1, 1]} : vector<16x32xf32> to vector<16x31xf32>
    %181 = tpu.concatenate %179, %180 in 1 : vector<16x1xf32>, vector<16x31xf32> -> vector<16x32xf32>
    %c-1_i32_70 = arith.constant -1 : i32
    %182 = vector.broadcast %c-1_i32_70 : i32 to vector<16x32xi32>
    %183 = arith.addi %16, %182 : vector<16x32xi32>
    %c0_i32_71 = arith.constant 0 : i32
    %184 = vector.broadcast %c0_i32_71 : i32 to vector<16x32xi32>
    %185 = arith.cmpi sge, %183, %184 : vector<16x32xi32>
    %c-1_i32_72 = arith.constant -1 : i32
    %186 = vector.broadcast %c-1_i32_72 : i32 to vector<16x32xi32>
    %187 = arith.addi %16, %186 : vector<16x32xi32>
    %c16_i32_73 = arith.constant 16 : i32
    %188 = vector.broadcast %c16_i32_73 : i32 to vector<16x32xi32>
    %189 = arith.cmpi slt, %187, %188 : vector<16x32xi32>
    %190 = arith.andi %185, %189 : vector<16x32xi1>
    %cst_74 = arith.constant 0.000000e+00 : f32
    %191 = vector.broadcast %cst_74 : f32 to vector<16x32xf32>
    %192 = arith.select %190, %181, %191 : vector<16x32xi1>, vector<16x32xf32>
    %cst_75 = arith.constant -0.275750965 : f32
    %193 = vector.broadcast %cst_75 : f32 to vector<16x32xf32>
    %194 = arith.mulf %192, %193 : vector<16x32xf32>
    %195 = arith.addf %178, %194 : vector<16x32xf32>
    %cst_76 = arith.constant -0.15867576 : f32
    %196 = vector.broadcast %cst_76 : f32 to vector<16x32xf32>
    %197 = arith.mulf %138, %196 : vector<16x32xf32>
    %198 = arith.addf %195, %197 : vector<16x32xf32>
    %199 = vector.extract_strided_slice %138 {offsets = [0, 1], sizes = [16, 31], strides = [1, 1]} : vector<16x32xf32> to vector<16x31xf32>
    %cst_77 = arith.constant 0.000000e+00 : f32
    %200 = vector.broadcast %cst_77 : f32 to vector<16x1xf32>
    %201 = tpu.concatenate %199, %200 in 1 : vector<16x31xf32>, vector<16x1xf32> -> vector<16x32xf32>
    %c1_i32_78 = arith.constant 1 : i32
    %202 = vector.broadcast %c1_i32_78 : i32 to vector<16x32xi32>
    %203 = arith.addi %16, %202 : vector<16x32xi32>
    %c0_i32_79 = arith.constant 0 : i32
    %204 = vector.broadcast %c0_i32_79 : i32 to vector<16x32xi32>
    %205 = arith.cmpi sge, %203, %204 : vector<16x32xi32>
    %c1_i32_80 = arith.constant 1 : i32
    %206 = vector.broadcast %c1_i32_80 : i32 to vector<16x32xi32>
    %207 = arith.addi %16, %206 : vector<16x32xi32>
    %c16_i32_81 = arith.constant 16 : i32
    %208 = vector.broadcast %c16_i32_81 : i32 to vector<16x32xi32>
    %209 = arith.cmpi slt, %207, %208 : vector<16x32xi32>
    %210 = arith.andi %205, %209 : vector<16x32xi1>
    %cst_82 = arith.constant 0.000000e+00 : f32
    %211 = vector.broadcast %cst_82 : f32 to vector<16x32xf32>
    %212 = arith.select %210, %201, %211 : vector<16x32xi1>, vector<16x32xf32>
    %cst_83 = arith.constant -0.0790520757 : f32
    %213 = vector.broadcast %cst_83 : f32 to vector<16x32xf32>
    %214 = arith.mulf %212, %213 : vector<16x32xf32>
    %215 = arith.addf %198, %214 : vector<16x32xf32>
    %216 = vector.extract_strided_slice %138 {offsets = [1, 0], sizes = [15, 32], strides = [1, 1]} : vector<16x32xf32> to vector<15x32xf32>
    %cst_84 = arith.constant 0.000000e+00 : f32
    %217 = vector.broadcast %cst_84 : f32 to vector<1x32xf32>
    %218 = tpu.concatenate %216, %217 in 0 : vector<15x32xf32>, vector<1x32xf32> -> vector<16x32xf32>
    %cst_85 = arith.constant 0.000000e+00 : f32
    %219 = vector.broadcast %cst_85 : f32 to vector<16x1xf32>
    %220 = vector.extract_strided_slice %218 {offsets = [0, 0], sizes = [16, 31], strides = [1, 1]} : vector<16x32xf32> to vector<16x31xf32>
    %221 = tpu.concatenate %219, %220 in 1 : vector<16x1xf32>, vector<16x31xf32> -> vector<16x32xf32>
    %c-1_i32_86 = arith.constant -1 : i32
    %222 = vector.broadcast %c-1_i32_86 : i32 to vector<16x32xi32>
    %223 = arith.addi %16, %222 : vector<16x32xi32>
    %c0_i32_87 = arith.constant 0 : i32
    %224 = vector.broadcast %c0_i32_87 : i32 to vector<16x32xi32>
    %225 = arith.cmpi sge, %223, %224 : vector<16x32xi32>
    %c-1_i32_88 = arith.constant -1 : i32
    %226 = vector.broadcast %c-1_i32_88 : i32 to vector<16x32xi32>
    %227 = arith.addi %16, %226 : vector<16x32xi32>
    %c16_i32_89 = arith.constant 16 : i32
    %228 = vector.broadcast %c16_i32_89 : i32 to vector<16x32xi32>
    %229 = arith.cmpi slt, %227, %228 : vector<16x32xi32>
    %230 = arith.andi %225, %229 : vector<16x32xi1>
    %cst_90 = arith.constant 0.000000e+00 : f32
    %231 = vector.broadcast %cst_90 : f32 to vector<16x32xf32>
    %232 = arith.select %230, %221, %231 : vector<16x32xi1>, vector<16x32xf32>
    %cst_91 = arith.constant 0.0938436314 : f32
    %233 = vector.broadcast %cst_91 : f32 to vector<16x32xf32>
    %234 = arith.mulf %232, %233 : vector<16x32xf32>
    %235 = arith.addf %215, %234 : vector<16x32xf32>
    %cst_92 = arith.constant -0.252268255 : f32
    %236 = vector.broadcast %cst_92 : f32 to vector<16x32xf32>
    %237 = arith.mulf %218, %236 : vector<16x32xf32>
    %238 = arith.addf %235, %237 : vector<16x32xf32>
    %239 = vector.extract_strided_slice %218 {offsets = [0, 1], sizes = [16, 31], strides = [1, 1]} : vector<16x32xf32> to vector<16x31xf32>
    %cst_93 = arith.constant 0.000000e+00 : f32
    %240 = vector.broadcast %cst_93 : f32 to vector<16x1xf32>
    %241 = tpu.concatenate %239, %240 in 1 : vector<16x31xf32>, vector<16x1xf32> -> vector<16x32xf32>
    %c1_i32_94 = arith.constant 1 : i32
    %242 = vector.broadcast %c1_i32_94 : i32 to vector<16x32xi32>
    %243 = arith.addi %16, %242 : vector<16x32xi32>
    %c0_i32_95 = arith.constant 0 : i32
    %244 = vector.broadcast %c0_i32_95 : i32 to vector<16x32xi32>
    %245 = arith.cmpi sge, %243, %244 : vector<16x32xi32>
    %c1_i32_96 = arith.constant 1 : i32
    %246 = vector.broadcast %c1_i32_96 : i32 to vector<16x32xi32>
    %247 = arith.addi %16, %246 : vector<16x32xi32>
    %c16_i32_97 = arith.constant 16 : i32
    %248 = vector.broadcast %c16_i32_97 : i32 to vector<16x32xi32>
    %249 = arith.cmpi slt, %247, %248 : vector<16x32xi32>
    %250 = arith.andi %245, %249 : vector<16x32xi1>
    %cst_98 = arith.constant 0.000000e+00 : f32
    %251 = vector.broadcast %cst_98 : f32 to vector<16x32xf32>
    %252 = arith.select %250, %241, %251 : vector<16x32xi1>, vector<16x32xf32>
    %cst_99 = arith.constant -0.0146778161 : f32
    %253 = vector.broadcast %cst_99 : f32 to vector<16x32xf32>
    %254 = arith.mulf %252, %253 : vector<16x32xf32>
    %255 = arith.addf %238, %254 : vector<16x32xf32>
    %c2 = arith.constant 2 : index
    %c0_100 = arith.constant 0 : index
    %c0_101 = arith.constant 0 : index
    %256 = vector.load %arg0[%c2, %c0_100, %c0_101] : memref<4x16x32xf32, #tpu.memory_space<vmem>>, vector<1x16x32xf32>
    %257 = vector.shape_cast %256 : vector<1x16x32xf32> to vector<16x32xf32>
    %cst_102 = arith.constant 0.000000e+00 : f32
    %258 = vector.broadcast %cst_102 : f32 to vector<1x32xf32>
    %259 = vector.extract_strided_slice %257 {offsets = [0, 0], sizes = [15, 32], strides = [1, 1]} : vector<16x32xf32> to vector<15x32xf32>
    %260 = tpu.concatenate %258, %259 in 0 : vector<1x32xf32>, vector<15x32xf32> -> vector<16x32xf32>
    %cst_103 = arith.constant 0.000000e+00 : f32
    %261 = vector.broadcast %cst_103 : f32 to vector<16x1xf32>
    %262 = vector.extract_strided_slice %260 {offsets = [0, 0], sizes = [16, 31], strides = [1, 1]} : vector<16x32xf32> to vector<16x31xf32>
    %263 = tpu.concatenate %261, %262 in 1 : vector<16x1xf32>, vector<16x31xf32> -> vector<16x32xf32>
    %c-1_i32_104 = arith.constant -1 : i32
    %264 = vector.broadcast %c-1_i32_104 : i32 to vector<16x32xi32>
    %265 = arith.addi %16, %264 : vector<16x32xi32>
    %c0_i32_105 = arith.constant 0 : i32
    %266 = vector.broadcast %c0_i32_105 : i32 to vector<16x32xi32>
    %267 = arith.cmpi sge, %265, %266 : vector<16x32xi32>
    %c-1_i32_106 = arith.constant -1 : i32
    %268 = vector.broadcast %c-1_i32_106 : i32 to vector<16x32xi32>
    %269 = arith.addi %16, %268 : vector<16x32xi32>
    %c16_i32_107 = arith.constant 16 : i32
    %270 = vector.broadcast %c16_i32_107 : i32 to vector<16x32xi32>
    %271 = arith.cmpi slt, %269, %270 : vector<16x32xi32>
    %272 = arith.andi %267, %271 : vector<16x32xi1>
    %cst_108 = arith.constant 0.000000e+00 : f32
    %273 = vector.broadcast %cst_108 : f32 to vector<16x32xf32>
    %274 = arith.select %272, %263, %273 : vector<16x32xi1>, vector<16x32xf32>
    %cst_109 = arith.constant -0.202624038 : f32
    %275 = vector.broadcast %cst_109 : f32 to vector<16x32xf32>
    %276 = arith.mulf %274, %275 : vector<16x32xf32>
    %277 = arith.addf %255, %276 : vector<16x32xf32>
    %cst_110 = arith.constant -0.415134102 : f32
    %278 = vector.broadcast %cst_110 : f32 to vector<16x32xf32>
    %279 = arith.mulf %260, %278 : vector<16x32xf32>
    %280 = arith.addf %277, %279 : vector<16x32xf32>
    %281 = vector.extract_strided_slice %260 {offsets = [0, 1], sizes = [16, 31], strides = [1, 1]} : vector<16x32xf32> to vector<16x31xf32>
    %cst_111 = arith.constant 0.000000e+00 : f32
    %282 = vector.broadcast %cst_111 : f32 to vector<16x1xf32>
    %283 = tpu.concatenate %281, %282 in 1 : vector<16x31xf32>, vector<16x1xf32> -> vector<16x32xf32>
    %c1_i32_112 = arith.constant 1 : i32
    %284 = vector.broadcast %c1_i32_112 : i32 to vector<16x32xi32>
    %285 = arith.addi %16, %284 : vector<16x32xi32>
    %c0_i32_113 = arith.constant 0 : i32
    %286 = vector.broadcast %c0_i32_113 : i32 to vector<16x32xi32>
    %287 = arith.cmpi sge, %285, %286 : vector<16x32xi32>
    %c1_i32_114 = arith.constant 1 : i32
    %288 = vector.broadcast %c1_i32_114 : i32 to vector<16x32xi32>
    %289 = arith.addi %16, %288 : vector<16x32xi32>
    %c16_i32_115 = arith.constant 16 : i32
    %290 = vector.broadcast %c16_i32_115 : i32 to vector<16x32xi32>
    %291 = arith.cmpi slt, %289, %290 : vector<16x32xi32>
    %292 = arith.andi %287, %291 : vector<16x32xi1>
    %cst_116 = arith.constant 0.000000e+00 : f32
    %293 = vector.broadcast %cst_116 : f32 to vector<16x32xf32>
    %294 = arith.select %292, %283, %293 : vector<16x32xi1>, vector<16x32xf32>
    %cst_117 = arith.constant -0.234400868 : f32
    %295 = vector.broadcast %cst_117 : f32 to vector<16x32xf32>
    %296 = arith.mulf %294, %295 : vector<16x32xf32>
    %297 = arith.addf %280, %296 : vector<16x32xf32>
    %cst_118 = arith.constant 0.000000e+00 : f32
    %298 = vector.broadcast %cst_118 : f32 to vector<16x1xf32>
    %299 = vector.extract_strided_slice %257 {offsets = [0, 0], sizes = [16, 31], strides = [1, 1]} : vector<16x32xf32> to vector<16x31xf32>
    %300 = tpu.concatenate %298, %299 in 1 : vector<16x1xf32>, vector<16x31xf32> -> vector<16x32xf32>
    %c-1_i32_119 = arith.constant -1 : i32
    %301 = vector.broadcast %c-1_i32_119 : i32 to vector<16x32xi32>
    %302 = arith.addi %16, %301 : vector<16x32xi32>
    %c0_i32_120 = arith.constant 0 : i32
    %303 = vector.broadcast %c0_i32_120 : i32 to vector<16x32xi32>
    %304 = arith.cmpi sge, %302, %303 : vector<16x32xi32>
    %c-1_i32_121 = arith.constant -1 : i32
    %305 = vector.broadcast %c-1_i32_121 : i32 to vector<16x32xi32>
    %306 = arith.addi %16, %305 : vector<16x32xi32>
    %c16_i32_122 = arith.constant 16 : i32
    %307 = vector.broadcast %c16_i32_122 : i32 to vector<16x32xi32>
    %308 = arith.cmpi slt, %306, %307 : vector<16x32xi32>
    %309 = arith.andi %304, %308 : vector<16x32xi1>
    %cst_123 = arith.constant 0.000000e+00 : f32
    %310 = vector.broadcast %cst_123 : f32 to vector<16x32xf32>
    %311 = arith.select %309, %300, %310 : vector<16x32xi1>, vector<16x32xf32>
    %cst_124 = arith.constant -0.0682447478 : f32
    %312 = vector.broadcast %cst_124 : f32 to vector<16x32xf32>
    %313 = arith.mulf %311, %312 : vector<16x32xf32>
    %314 = arith.addf %297, %313 : vector<16x32xf32>
    %cst_125 = arith.constant 0.281945825 : f32
    %315 = vector.broadcast %cst_125 : f32 to vector<16x32xf32>
    %316 = arith.mulf %257, %315 : vector<16x32xf32>
    %317 = arith.addf %314, %316 : vector<16x32xf32>
    %318 = vector.extract_strided_slice %257 {offsets = [0, 1], sizes = [16, 31], strides = [1, 1]} : vector<16x32xf32> to vector<16x31xf32>
    %cst_126 = arith.constant 0.000000e+00 : f32
    %319 = vector.broadcast %cst_126 : f32 to vector<16x1xf32>
    %320 = tpu.concatenate %318, %319 in 1 : vector<16x31xf32>, vector<16x1xf32> -> vector<16x32xf32>
    %c1_i32_127 = arith.constant 1 : i32
    %321 = vector.broadcast %c1_i32_127 : i32 to vector<16x32xi32>
    %322 = arith.addi %16, %321 : vector<16x32xi32>
    %c0_i32_128 = arith.constant 0 : i32
    %323 = vector.broadcast %c0_i32_128 : i32 to vector<16x32xi32>
    %324 = arith.cmpi sge, %322, %323 : vector<16x32xi32>
    %c1_i32_129 = arith.constant 1 : i32
    %325 = vector.broadcast %c1_i32_129 : i32 to vector<16x32xi32>
    %326 = arith.addi %16, %325 : vector<16x32xi32>
    %c16_i32_130 = arith.constant 16 : i32
    %327 = vector.broadcast %c16_i32_130 : i32 to vector<16x32xi32>
    %328 = arith.cmpi slt, %326, %327 : vector<16x32xi32>
    %329 = arith.andi %324, %328 : vector<16x32xi1>
    %cst_131 = arith.constant 0.000000e+00 : f32
    %330 = vector.broadcast %cst_131 : f32 to vector<16x32xf32>
    %331 = arith.select %329, %320, %330 : vector<16x32xi1>, vector<16x32xf32>
    %cst_132 = arith.constant 0.172142863 : f32
    %332 = vector.broadcast %cst_132 : f32 to vector<16x32xf32>
    %333 = arith.mulf %331, %332 : vector<16x32xf32>
    %334 = arith.addf %317, %333 : vector<16x32xf32>
    %335 = vector.extract_strided_slice %257 {offsets = [1, 0], sizes = [15, 32], strides = [1, 1]} : vector<16x32xf32> to vector<15x32xf32>
    %cst_133 = arith.constant 0.000000e+00 : f32
    %336 = vector.broadcast %cst_133 : f32 to vector<1x32xf32>
    %337 = tpu.concatenate %335, %336 in 0 : vector<15x32xf32>, vector<1x32xf32> -> vector<16x32xf32>
    %cst_134 = arith.constant 0.000000e+00 : f32
    %338 = vector.broadcast %cst_134 : f32 to vector<16x1xf32>
    %339 = vector.extract_strided_slice %337 {offsets = [0, 0], sizes = [16, 31], strides = [1, 1]} : vector<16x32xf32> to vector<16x31xf32>
    %340 = tpu.concatenate %338, %339 in 1 : vector<16x1xf32>, vector<16x31xf32> -> vector<16x32xf32>
    %c-1_i32_135 = arith.constant -1 : i32
    %341 = vector.broadcast %c-1_i32_135 : i32 to vector<16x32xi32>
    %342 = arith.addi %16, %341 : vector<16x32xi32>
    %c0_i32_136 = arith.constant 0 : i32
    %343 = vector.broadcast %c0_i32_136 : i32 to vector<16x32xi32>
    %344 = arith.cmpi sge, %342, %343 : vector<16x32xi32>
    %c-1_i32_137 = arith.constant -1 : i32
    %345 = vector.broadcast %c-1_i32_137 : i32 to vector<16x32xi32>
    %346 = arith.addi %16, %345 : vector<16x32xi32>
    %c16_i32_138 = arith.constant 16 : i32
    %347 = vector.broadcast %c16_i32_138 : i32 to vector<16x32xi32>
    %348 = arith.cmpi slt, %346, %347 : vector<16x32xi32>
    %349 = arith.andi %344, %348 : vector<16x32xi1>
    %cst_139 = arith.constant 0.000000e+00 : f32
    %350 = vector.broadcast %cst_139 : f32 to vector<16x32xf32>
    %351 = arith.select %349, %340, %350 : vector<16x32xi1>, vector<16x32xf32>
    %cst_140 = arith.constant -0.245597377 : f32
    %352 = vector.broadcast %cst_140 : f32 to vector<16x32xf32>
    %353 = arith.mulf %351, %352 : vector<16x32xf32>
    %354 = arith.addf %334, %353 : vector<16x32xf32>
    %cst_141 = arith.constant -0.115132809 : f32
    %355 = vector.broadcast %cst_141 : f32 to vector<16x32xf32>
    %356 = arith.mulf %337, %355 : vector<16x32xf32>
    %357 = arith.addf %354, %356 : vector<16x32xf32>
    %358 = vector.extract_strided_slice %337 {offsets = [0, 1], sizes = [16, 31], strides = [1, 1]} : vector<16x32xf32> to vector<16x31xf32>
    %cst_142 = arith.constant 0.000000e+00 : f32
    %359 = vector.broadcast %cst_142 : f32 to vector<16x1xf32>
    %360 = tpu.concatenate %358, %359 in 1 : vector<16x31xf32>, vector<16x1xf32> -> vector<16x32xf32>
    %c1_i32_143 = arith.constant 1 : i32
    %361 = vector.broadcast %c1_i32_143 : i32 to vector<16x32xi32>
    %362 = arith.addi %16, %361 : vector<16x32xi32>
    %c0_i32_144 = arith.constant 0 : i32
    %363 = vector.broadcast %c0_i32_144 : i32 to vector<16x32xi32>
    %364 = arith.cmpi sge, %362, %363 : vector<16x32xi32>
    %c1_i32_145 = arith.constant 1 : i32
    %365 = vector.broadcast %c1_i32_145 : i32 to vector<16x32xi32>
    %366 = arith.addi %16, %365 : vector<16x32xi32>
    %c16_i32_146 = arith.constant 16 : i32
    %367 = vector.broadcast %c16_i32_146 : i32 to vector<16x32xi32>
    %368 = arith.cmpi slt, %366, %367 : vector<16x32xi32>
    %369 = arith.andi %364, %368 : vector<16x32xi1>
    %cst_147 = arith.constant 0.000000e+00 : f32
    %370 = vector.broadcast %cst_147 : f32 to vector<16x32xf32>
    %371 = arith.select %369, %360, %370 : vector<16x32xi1>, vector<16x32xf32>
    %cst_148 = arith.constant 0.171208978 : f32
    %372 = vector.broadcast %cst_148 : f32 to vector<16x32xf32>
    %373 = arith.mulf %371, %372 : vector<16x32xf32>
    %374 = arith.addf %357, %373 : vector<16x32xf32>
    %c3 = arith.constant 3 : index
    %c0_149 = arith.constant 0 : index
    %c0_150 = arith.constant 0 : index
    %375 = vector.load %arg0[%c3, %c0_149, %c0_150] : memref<4x16x32xf32, #tpu.memory_space<vmem>>, vector<1x16x32xf32>
    %376 = vector.shape_cast %375 : vector<1x16x32xf32> to vector<16x32xf32>
    %cst_151 = arith.constant 0.000000e+00 : f32
    %377 = vector.broadcast %cst_151 : f32 to vector<1x32xf32>
    %378 = vector.extract_strided_slice %376 {offsets = [0, 0], sizes = [15, 32], strides = [1, 1]} : vector<16x32xf32> to vector<15x32xf32>
    %379 = tpu.concatenate %377, %378 in 0 : vector<1x32xf32>, vector<15x32xf32> -> vector<16x32xf32>
    %cst_152 = arith.constant 0.000000e+00 : f32
    %380 = vector.broadcast %cst_152 : f32 to vector<16x1xf32>
    %381 = vector.extract_strided_slice %379 {offsets = [0, 0], sizes = [16, 31], strides = [1, 1]} : vector<16x32xf32> to vector<16x31xf32>
    %382 = tpu.concatenate %380, %381 in 1 : vector<16x1xf32>, vector<16x31xf32> -> vector<16x32xf32>
    %c-1_i32_153 = arith.constant -1 : i32
    %383 = vector.broadcast %c-1_i32_153 : i32 to vector<16x32xi32>
    %384 = arith.addi %16, %383 : vector<16x32xi32>
    %c0_i32_154 = arith.constant 0 : i32
    %385 = vector.broadcast %c0_i32_154 : i32 to vector<16x32xi32>
    %386 = arith.cmpi sge, %384, %385 : vector<16x32xi32>
    %c-1_i32_155 = arith.constant -1 : i32
    %387 = vector.broadcast %c-1_i32_155 : i32 to vector<16x32xi32>
    %388 = arith.addi %16, %387 : vector<16x32xi32>
    %c16_i32_156 = arith.constant 16 : i32
    %389 = vector.broadcast %c16_i32_156 : i32 to vector<16x32xi32>
    %390 = arith.cmpi slt, %388, %389 : vector<16x32xi32>
    %391 = arith.andi %386, %390 : vector<16x32xi1>
    %cst_157 = arith.constant 0.000000e+00 : f32
    %392 = vector.broadcast %cst_157 : f32 to vector<16x32xf32>
    %393 = arith.select %391, %382, %392 : vector<16x32xi1>, vector<16x32xf32>
    %cst_158 = arith.constant 0.3506715 : f32
    %394 = vector.broadcast %cst_158 : f32 to vector<16x32xf32>
    %395 = arith.mulf %393, %394 : vector<16x32xf32>
    %396 = arith.addf %374, %395 : vector<16x32xf32>
    %cst_159 = arith.constant -0.0867478102 : f32
    %397 = vector.broadcast %cst_159 : f32 to vector<16x32xf32>
    %398 = arith.mulf %379, %397 : vector<16x32xf32>
    %399 = arith.addf %396, %398 : vector<16x32xf32>
    %400 = vector.extract_strided_slice %379 {offsets = [0, 1], sizes = [16, 31], strides = [1, 1]} : vector<16x32xf32> to vector<16x31xf32>
    %cst_160 = arith.constant 0.000000e+00 : f32
    %401 = vector.broadcast %cst_160 : f32 to vector<16x1xf32>
    %402 = tpu.concatenate %400, %401 in 1 : vector<16x31xf32>, vector<16x1xf32> -> vector<16x32xf32>
    %c1_i32_161 = arith.constant 1 : i32
    %403 = vector.broadcast %c1_i32_161 : i32 to vector<16x32xi32>
    %404 = arith.addi %16, %403 : vector<16x32xi32>
    %c0_i32_162 = arith.constant 0 : i32
    %405 = vector.broadcast %c0_i32_162 : i32 to vector<16x32xi32>
    %406 = arith.cmpi sge, %404, %405 : vector<16x32xi32>
    %c1_i32_163 = arith.constant 1 : i32
    %407 = vector.broadcast %c1_i32_163 : i32 to vector<16x32xi32>
    %408 = arith.addi %16, %407 : vector<16x32xi32>
    %c16_i32_164 = arith.constant 16 : i32
    %409 = vector.broadcast %c16_i32_164 : i32 to vector<16x32xi32>
    %410 = arith.cmpi slt, %408, %409 : vector<16x32xi32>
    %411 = arith.andi %406, %410 : vector<16x32xi1>
    %cst_165 = arith.constant 0.000000e+00 : f32
    %412 = vector.broadcast %cst_165 : f32 to vector<16x32xf32>
    %413 = arith.select %411, %402, %412 : vector<16x32xi1>, vector<16x32xf32>
    %cst_166 = arith.constant 0.0114209438 : f32
    %414 = vector.broadcast %cst_166 : f32 to vector<16x32xf32>
    %415 = arith.mulf %413, %414 : vector<16x32xf32>
    %416 = arith.addf %399, %415 : vector<16x32xf32>
    %cst_167 = arith.constant 0.000000e+00 : f32
    %417 = vector.broadcast %cst_167 : f32 to vector<16x1xf32>
    %418 = vector.extract_strided_slice %376 {offsets = [0, 0], sizes = [16, 31], strides = [1, 1]} : vector<16x32xf32> to vector<16x31xf32>
    %419 = tpu.concatenate %417, %418 in 1 : vector<16x1xf32>, vector<16x31xf32> -> vector<16x32xf32>
    %c-1_i32_168 = arith.constant -1 : i32
    %420 = vector.broadcast %c-1_i32_168 : i32 to vector<16x32xi32>
    %421 = arith.addi %16, %420 : vector<16x32xi32>
    %c0_i32_169 = arith.constant 0 : i32
    %422 = vector.broadcast %c0_i32_169 : i32 to vector<16x32xi32>
    %423 = arith.cmpi sge, %421, %422 : vector<16x32xi32>
    %c-1_i32_170 = arith.constant -1 : i32
    %424 = vector.broadcast %c-1_i32_170 : i32 to vector<16x32xi32>
    %425 = arith.addi %16, %424 : vector<16x32xi32>
    %c16_i32_171 = arith.constant 16 : i32
    %426 = vector.broadcast %c16_i32_171 : i32 to vector<16x32xi32>
    %427 = arith.cmpi slt, %425, %426 : vector<16x32xi32>
    %428 = arith.andi %423, %427 : vector<16x32xi1>
    %cst_172 = arith.constant 0.000000e+00 : f32
    %429 = vector.broadcast %cst_172 : f32 to vector<16x32xf32>
    %430 = arith.select %428, %419, %429 : vector<16x32xi1>, vector<16x32xf32>
    %cst_173 = arith.constant -0.137417287 : f32
    %431 = vector.broadcast %cst_173 : f32 to vector<16x32xf32>
    %432 = arith.mulf %430, %431 : vector<16x32xf32>
    %433 = arith.addf %416, %432 : vector<16x32xf32>
    %cst_174 = arith.constant -0.37461853 : f32
    %434 = vector.broadcast %cst_174 : f32 to vector<16x32xf32>
    %435 = arith.mulf %376, %434 : vector<16x32xf32>
    %436 = arith.addf %433, %435 : vector<16x32xf32>
    %437 = vector.extract_strided_slice %376 {offsets = [0, 1], sizes = [16, 31], strides = [1, 1]} : vector<16x32xf32> to vector<16x31xf32>
    %cst_175 = arith.constant 0.000000e+00 : f32
    %438 = vector.broadcast %cst_175 : f32 to vector<16x1xf32>
    %439 = tpu.concatenate %437, %438 in 1 : vector<16x31xf32>, vector<16x1xf32> -> vector<16x32xf32>
    %c1_i32_176 = arith.constant 1 : i32
    %440 = vector.broadcast %c1_i32_176 : i32 to vector<16x32xi32>
    %441 = arith.addi %16, %440 : vector<16x32xi32>
    %c0_i32_177 = arith.constant 0 : i32
    %442 = vector.broadcast %c0_i32_177 : i32 to vector<16x32xi32>
    %443 = arith.cmpi sge, %441, %442 : vector<16x32xi32>
    %c1_i32_178 = arith.constant 1 : i32
    %444 = vector.broadcast %c1_i32_178 : i32 to vector<16x32xi32>
    %445 = arith.addi %16, %444 : vector<16x32xi32>
    %c16_i32_179 = arith.constant 16 : i32
    %446 = vector.broadcast %c16_i32_179 : i32 to vector<16x32xi32>
    %447 = arith.cmpi slt, %445, %446 : vector<16x32xi32>
    %448 = arith.andi %443, %447 : vector<16x32xi1>
    %cst_180 = arith.constant 0.000000e+00 : f32
    %449 = vector.broadcast %cst_180 : f32 to vector<16x32xf32>
    %450 = arith.select %448, %439, %449 : vector<16x32xi1>, vector<16x32xf32>
    %cst_181 = arith.constant -0.0448310301 : f32
    %451 = vector.broadcast %cst_181 : f32 to vector<16x32xf32>
    %452 = arith.mulf %450, %451 : vector<16x32xf32>
    %453 = arith.addf %436, %452 : vector<16x32xf32>
    %454 = vector.extract_strided_slice %376 {offsets = [1, 0], sizes = [15, 32], strides = [1, 1]} : vector<16x32xf32> to vector<15x32xf32>
    %cst_182 = arith.constant 0.000000e+00 : f32
    %455 = vector.broadcast %cst_182 : f32 to vector<1x32xf32>
    %456 = tpu.concatenate %454, %455 in 0 : vector<15x32xf32>, vector<1x32xf32> -> vector<16x32xf32>
    %cst_183 = arith.constant 0.000000e+00 : f32
    %457 = vector.broadcast %cst_183 : f32 to vector<16x1xf32>
    %458 = vector.extract_strided_slice %456 {offsets = [0, 0], sizes = [16, 31], strides = [1, 1]} : vector<16x32xf32> to vector<16x31xf32>
    %459 = tpu.concatenate %457, %458 in 1 : vector<16x1xf32>, vector<16x31xf32> -> vector<16x32xf32>
    %c-1_i32_184 = arith.constant -1 : i32
    %460 = vector.broadcast %c-1_i32_184 : i32 to vector<16x32xi32>
    %461 = arith.addi %16, %460 : vector<16x32xi32>
    %c0_i32_185 = arith.constant 0 : i32
    %462 = vector.broadcast %c0_i32_185 : i32 to vector<16x32xi32>
    %463 = arith.cmpi sge, %461, %462 : vector<16x32xi32>
    %c-1_i32_186 = arith.constant -1 : i32
    %464 = vector.broadcast %c-1_i32_186 : i32 to vector<16x32xi32>
    %465 = arith.addi %16, %464 : vector<16x32xi32>
    %c16_i32_187 = arith.constant 16 : i32
    %466 = vector.broadcast %c16_i32_187 : i32 to vector<16x32xi32>
    %467 = arith.cmpi slt, %465, %466 : vector<16x32xi32>
    %468 = arith.andi %463, %467 : vector<16x32xi1>
    %cst_188 = arith.constant 0.000000e+00 : f32
    %469 = vector.broadcast %cst_188 : f32 to vector<16x32xf32>
    %470 = arith.select %468, %459, %469 : vector<16x32xi1>, vector<16x32xf32>
    %cst_189 = arith.constant 1.954970e-01 : f32
    %471 = vector.broadcast %cst_189 : f32 to vector<16x32xf32>
    %472 = arith.mulf %470, %471 : vector<16x32xf32>
    %473 = arith.addf %453, %472 : vector<16x32xf32>
    %cst_190 = arith.constant -0.275280088 : f32
    %474 = vector.broadcast %cst_190 : f32 to vector<16x32xf32>
    %475 = arith.mulf %456, %474 : vector<16x32xf32>
    %476 = arith.addf %473, %475 : vector<16x32xf32>
    %477 = vector.extract_strided_slice %456 {offsets = [0, 1], sizes = [16, 31], strides = [1, 1]} : vector<16x32xf32> to vector<16x31xf32>
    %cst_191 = arith.constant 0.000000e+00 : f32
    %478 = vector.broadcast %cst_191 : f32 to vector<16x1xf32>
    %479 = tpu.concatenate %477, %478 in 1 : vector<16x31xf32>, vector<16x1xf32> -> vector<16x32xf32>
    %c1_i32_192 = arith.constant 1 : i32
    %480 = vector.broadcast %c1_i32_192 : i32 to vector<16x32xi32>
    %481 = arith.addi %16, %480 : vector<16x32xi32>
    %c0_i32_193 = arith.constant 0 : i32
    %482 = vector.broadcast %c0_i32_193 : i32 to vector<16x32xi32>
    %483 = arith.cmpi sge, %481, %482 : vector<16x32xi32>
    %c1_i32_194 = arith.constant 1 : i32
    %484 = vector.broadcast %c1_i32_194 : i32 to vector<16x32xi32>
    %485 = arith.addi %16, %484 : vector<16x32xi32>
    %c16_i32_195 = arith.constant 16 : i32
    %486 = vector.broadcast %c16_i32_195 : i32 to vector<16x32xi32>
    %487 = arith.cmpi slt, %485, %486 : vector<16x32xi32>
    %488 = arith.andi %483, %487 : vector<16x32xi1>
    %cst_196 = arith.constant 0.000000e+00 : f32
    %489 = vector.broadcast %cst_196 : f32 to vector<16x32xf32>
    %490 = arith.select %488, %479, %489 : vector<16x32xi1>, vector<16x32xf32>
    %cst_197 = arith.constant -0.151508823 : f32
    %491 = vector.broadcast %cst_197 : f32 to vector<16x32xf32>
    %492 = arith.mulf %490, %491 : vector<16x32xf32>
    %493 = arith.addf %476, %492 : vector<16x32xf32>
    %cst_198 = arith.constant -0.101149723 : f32
    %494 = vector.broadcast %cst_198 : f32 to vector<16x32xf32>
    %495 = arith.addf %493, %494 : vector<16x32xf32>
    %cst_199 = arith.constant 0.000000e+00 : f32
    %496 = vector.broadcast %cst_199 : f32 to vector<16x32xf32>
    %497 = arith.maximumf %495, %496 : vector<16x32xf32>
    %cst_200 = arith.constant 0.000000e+00 : f32
    %498 = vector.broadcast %cst_200 : f32 to vector<16x32xf32>
    %cst_201 = arith.constant 0.000000e+00 : f32
    %499 = vector.broadcast %cst_201 : f32 to vector<2x32xf32>
    %500 = vector.extract_strided_slice %497 {offsets = [0, 0], sizes = [14, 32], strides = [1, 1]} : vector<16x32xf32> to vector<14x32xf32>
    %501 = tpu.concatenate %499, %500 in 0 : vector<2x32xf32>, vector<14x32xf32> -> vector<16x32xf32>
    %cst_202 = arith.constant 0.545796156 : f32
    %502 = vector.broadcast %cst_202 : f32 to vector<16x32xf32>
    %503 = arith.mulf %501, %502 : vector<16x32xf32>
    %504 = arith.addf %498, %503 : vector<16x32xf32>
    %cst_203 = arith.constant 0.000000e+00 : f32
    %505 = vector.broadcast %cst_203 : f32 to vector<1x32xf32>
    %506 = vector.extract_strided_slice %497 {offsets = [0, 0], sizes = [15, 32], strides = [1, 1]} : vector<16x32xf32> to vector<15x32xf32>
    %507 = tpu.concatenate %505, %506 in 0 : vector<1x32xf32>, vector<15x32xf32> -> vector<16x32xf32>
    %cst_204 = arith.constant 1.000000e+00 : f32
    %508 = vector.broadcast %cst_204 : f32 to vector<16x32xf32>
    %509 = arith.mulf %507, %508 : vector<16x32xf32>
    %510 = arith.addf %504, %509 : vector<16x32xf32>
    %cst_205 = arith.constant 1.000000e+00 : f32
    %511 = vector.broadcast %cst_205 : f32 to vector<16x32xf32>
    %512 = arith.mulf %497, %511 : vector<16x32xf32>
    %513 = arith.addf %510, %512 : vector<16x32xf32>
    %514 = vector.extract_strided_slice %497 {offsets = [1, 0], sizes = [15, 32], strides = [1, 1]} : vector<16x32xf32> to vector<15x32xf32>
    %cst_206 = arith.constant 0.000000e+00 : f32
    %515 = vector.broadcast %cst_206 : f32 to vector<1x32xf32>
    %516 = tpu.concatenate %514, %515 in 0 : vector<15x32xf32>, vector<1x32xf32> -> vector<16x32xf32>
    %cst_207 = arith.constant 1.000000e+00 : f32
    %517 = vector.broadcast %cst_207 : f32 to vector<16x32xf32>
    %518 = arith.mulf %516, %517 : vector<16x32xf32>
    %519 = arith.addf %513, %518 : vector<16x32xf32>
    %520 = vector.extract_strided_slice %497 {offsets = [2, 0], sizes = [14, 32], strides = [1, 1]} : vector<16x32xf32> to vector<14x32xf32>
    %cst_208 = arith.constant 0.000000e+00 : f32
    %521 = vector.broadcast %cst_208 : f32 to vector<2x32xf32>
    %522 = tpu.concatenate %520, %521 in 0 : vector<14x32xf32>, vector<2x32xf32> -> vector<16x32xf32>
    %cst_209 = arith.constant 0.346166372 : f32
    %523 = vector.broadcast %cst_209 : f32 to vector<16x32xf32>
    %524 = arith.mulf %522, %523 : vector<16x32xf32>
    %525 = arith.addf %519, %524 : vector<16x32xf32>
    %cst_210 = arith.constant 0.000000e+00 : f32
    %526 = vector.broadcast %cst_210 : f32 to vector<16x32xf32>
    %cst_211 = arith.constant 0.000000e+00 : f32
    %527 = vector.broadcast %cst_211 : f32 to vector<16x3xf32>
    %528 = vector.extract_strided_slice %525 {offsets = [0, 0], sizes = [16, 29], strides = [1, 1]} : vector<16x32xf32> to vector<16x29xf32>
    %529 = tpu.concatenate %527, %528 in 1 : vector<16x3xf32>, vector<16x29xf32> -> vector<16x32xf32>
    %c-3_i32 = arith.constant -3 : i32
    %530 = vector.broadcast %c-3_i32 : i32 to vector<16x32xi32>
    %531 = arith.addi %16, %530 : vector<16x32xi32>
    %c0_i32_212 = arith.constant 0 : i32
    %532 = vector.broadcast %c0_i32_212 : i32 to vector<16x32xi32>
    %533 = arith.cmpi sge, %531, %532 : vector<16x32xi32>
    %c-3_i32_213 = arith.constant -3 : i32
    %534 = vector.broadcast %c-3_i32_213 : i32 to vector<16x32xi32>
    %535 = arith.addi %16, %534 : vector<16x32xi32>
    %c16_i32_214 = arith.constant 16 : i32
    %536 = vector.broadcast %c16_i32_214 : i32 to vector<16x32xi32>
    %537 = arith.cmpi slt, %535, %536 : vector<16x32xi32>
    %538 = arith.andi %533, %537 : vector<16x32xi1>
    %cst_215 = arith.constant 0.000000e+00 : f32
    %539 = vector.broadcast %cst_215 : f32 to vector<16x32xf32>
    %540 = arith.select %538, %529, %539 : vector<16x32xi1>, vector<16x32xf32>
    %cst_216 = arith.constant 0.0179776121 : f32
    %541 = vector.broadcast %cst_216 : f32 to vector<16x32xf32>
    %542 = arith.mulf %540, %541 : vector<16x32xf32>
    %543 = arith.addf %526, %542 : vector<16x32xf32>
    %cst_217 = arith.constant 0.000000e+00 : f32
    %544 = vector.broadcast %cst_217 : f32 to vector<16x2xf32>
    %545 = vector.extract_strided_slice %525 {offsets = [0, 0], sizes = [16, 30], strides = [1, 1]} : vector<16x32xf32> to vector<16x30xf32>
    %546 = tpu.concatenate %544, %545 in 1 : vector<16x2xf32>, vector<16x30xf32> -> vector<16x32xf32>
    %c-2_i32 = arith.constant -2 : i32
    %547 = vector.broadcast %c-2_i32 : i32 to vector<16x32xi32>
    %548 = arith.addi %16, %547 : vector<16x32xi32>
    %c0_i32_218 = arith.constant 0 : i32
    %549 = vector.broadcast %c0_i32_218 : i32 to vector<16x32xi32>
    %550 = arith.cmpi sge, %548, %549 : vector<16x32xi32>
    %c-2_i32_219 = arith.constant -2 : i32
    %551 = vector.broadcast %c-2_i32_219 : i32 to vector<16x32xi32>
    %552 = arith.addi %16, %551 : vector<16x32xi32>
    %c16_i32_220 = arith.constant 16 : i32
    %553 = vector.broadcast %c16_i32_220 : i32 to vector<16x32xi32>
    %554 = arith.cmpi slt, %552, %553 : vector<16x32xi32>
    %555 = arith.andi %550, %554 : vector<16x32xi1>
    %cst_221 = arith.constant 0.000000e+00 : f32
    %556 = vector.broadcast %cst_221 : f32 to vector<16x32xf32>
    %557 = arith.select %555, %546, %556 : vector<16x32xi1>, vector<16x32xf32>
    %cst_222 = arith.constant 0.0746140108 : f32
    %558 = vector.broadcast %cst_222 : f32 to vector<16x32xf32>
    %559 = arith.mulf %557, %558 : vector<16x32xf32>
    %560 = arith.addf %543, %559 : vector<16x32xf32>
    %cst_223 = arith.constant 0.000000e+00 : f32
    %561 = vector.broadcast %cst_223 : f32 to vector<16x1xf32>
    %562 = vector.extract_strided_slice %525 {offsets = [0, 0], sizes = [16, 31], strides = [1, 1]} : vector<16x32xf32> to vector<16x31xf32>
    %563 = tpu.concatenate %561, %562 in 1 : vector<16x1xf32>, vector<16x31xf32> -> vector<16x32xf32>
    %c-1_i32_224 = arith.constant -1 : i32
    %564 = vector.broadcast %c-1_i32_224 : i32 to vector<16x32xi32>
    %565 = arith.addi %16, %564 : vector<16x32xi32>
    %c0_i32_225 = arith.constant 0 : i32
    %566 = vector.broadcast %c0_i32_225 : i32 to vector<16x32xi32>
    %567 = arith.cmpi sge, %565, %566 : vector<16x32xi32>
    %c-1_i32_226 = arith.constant -1 : i32
    %568 = vector.broadcast %c-1_i32_226 : i32 to vector<16x32xi32>
    %569 = arith.addi %16, %568 : vector<16x32xi32>
    %c16_i32_227 = arith.constant 16 : i32
    %570 = vector.broadcast %c16_i32_227 : i32 to vector<16x32xi32>
    %571 = arith.cmpi slt, %569, %570 : vector<16x32xi32>
    %572 = arith.andi %567, %571 : vector<16x32xi1>
    %cst_228 = arith.constant 0.000000e+00 : f32
    %573 = vector.broadcast %cst_228 : f32 to vector<16x32xf32>
    %574 = arith.select %572, %563, %573 : vector<16x32xi1>, vector<16x32xf32>
    %cst_229 = arith.constant 0.0746140108 : f32
    %575 = vector.broadcast %cst_229 : f32 to vector<16x32xf32>
    %576 = arith.mulf %574, %575 : vector<16x32xf32>
    %577 = arith.addf %560, %576 : vector<16x32xf32>
    %cst_230 = arith.constant 0.0746140108 : f32
    %578 = vector.broadcast %cst_230 : f32 to vector<16x32xf32>
    %579 = arith.mulf %525, %578 : vector<16x32xf32>
    %580 = arith.addf %577, %579 : vector<16x32xf32>
    %581 = vector.extract_strided_slice %525 {offsets = [0, 1], sizes = [16, 31], strides = [1, 1]} : vector<16x32xf32> to vector<16x31xf32>
    %cst_231 = arith.constant 0.000000e+00 : f32
    %582 = vector.broadcast %cst_231 : f32 to vector<16x1xf32>
    %583 = tpu.concatenate %581, %582 in 1 : vector<16x31xf32>, vector<16x1xf32> -> vector<16x32xf32>
    %c1_i32_232 = arith.constant 1 : i32
    %584 = vector.broadcast %c1_i32_232 : i32 to vector<16x32xi32>
    %585 = arith.addi %16, %584 : vector<16x32xi32>
    %c0_i32_233 = arith.constant 0 : i32
    %586 = vector.broadcast %c0_i32_233 : i32 to vector<16x32xi32>
    %587 = arith.cmpi sge, %585, %586 : vector<16x32xi32>
    %c1_i32_234 = arith.constant 1 : i32
    %588 = vector.broadcast %c1_i32_234 : i32 to vector<16x32xi32>
    %589 = arith.addi %16, %588 : vector<16x32xi32>
    %c16_i32_235 = arith.constant 16 : i32
    %590 = vector.broadcast %c16_i32_235 : i32 to vector<16x32xi32>
    %591 = arith.cmpi slt, %589, %590 : vector<16x32xi32>
    %592 = arith.andi %587, %591 : vector<16x32xi1>
    %cst_236 = arith.constant 0.000000e+00 : f32
    %593 = vector.broadcast %cst_236 : f32 to vector<16x32xf32>
    %594 = arith.select %592, %583, %593 : vector<16x32xi1>, vector<16x32xf32>
    %cst_237 = arith.constant 0.0234607141 : f32
    %595 = vector.broadcast %cst_237 : f32 to vector<16x32xf32>
    %596 = arith.mulf %594, %595 : vector<16x32xf32>
    %597 = arith.addf %580, %596 : vector<16x32xf32>
    %cst_238 = arith.constant -0.0978303551 : f32
    %598 = vector.broadcast %cst_238 : f32 to vector<16x32xf32>
    %599 = arith.addf %597, %598 : vector<16x32xf32>
    %cst_239 = arith.constant 0.000000e+00 : f32
    %600 = vector.broadcast %cst_239 : f32 to vector<16x32xf32>
    %601 = arith.maximumf %599, %600 : vector<16x32xf32>
    %cst_240 = arith.constant 0.000000e+00 : f32
    %602 = vector.broadcast %cst_240 : f32 to vector<16x32xf32>
    %cst_241 = arith.constant 0.000000e+00 : f32
    %603 = vector.broadcast %cst_241 : f32 to vector<3x32xf32>
    %604 = vector.extract_strided_slice %497 {offsets = [0, 0], sizes = [13, 32], strides = [1, 1]} : vector<16x32xf32> to vector<13x32xf32>
    %605 = tpu.concatenate %603, %604 in 0 : vector<3x32xf32>, vector<13x32xf32> -> vector<16x32xf32>
    %cst_242 = arith.constant 0.926496505 : f32
    %606 = vector.broadcast %cst_242 : f32 to vector<16x32xf32>
    %607 = arith.mulf %605, %606 : vector<16x32xf32>
    %608 = arith.addf %602, %607 : vector<16x32xf32>
    %cst_243 = arith.constant 1.000000e+00 : f32
    %609 = vector.broadcast %cst_243 : f32 to vector<16x32xf32>
    %610 = arith.mulf %501, %609 : vector<16x32xf32>
    %611 = arith.addf %608, %610 : vector<16x32xf32>
    %cst_244 = arith.constant 1.000000e+00 : f32
    %612 = vector.broadcast %cst_244 : f32 to vector<16x32xf32>
    %613 = arith.mulf %507, %612 : vector<16x32xf32>
    %614 = arith.addf %611, %613 : vector<16x32xf32>
    %cst_245 = arith.constant 0.502074122 : f32
    %615 = vector.broadcast %cst_245 : f32 to vector<16x32xf32>
    %616 = arith.mulf %497, %615 : vector<16x32xf32>
    %617 = arith.addf %614, %616 : vector<16x32xf32>
    %cst_246 = arith.constant 0.000000e+00 : f32
    %618 = vector.broadcast %cst_246 : f32 to vector<16x32xf32>
    %cst_247 = arith.constant 0.000000e+00 : f32
    %619 = vector.broadcast %cst_247 : f32 to vector<16x3xf32>
    %620 = vector.extract_strided_slice %617 {offsets = [0, 0], sizes = [16, 29], strides = [1, 1]} : vector<16x32xf32> to vector<16x29xf32>
    %621 = tpu.concatenate %619, %620 in 1 : vector<16x3xf32>, vector<16x29xf32> -> vector<16x32xf32>
    %c-3_i32_248 = arith.constant -3 : i32
    %622 = vector.broadcast %c-3_i32_248 : i32 to vector<16x32xi32>
    %623 = arith.addi %16, %622 : vector<16x32xi32>
    %c0_i32_249 = arith.constant 0 : i32
    %624 = vector.broadcast %c0_i32_249 : i32 to vector<16x32xi32>
    %625 = arith.cmpi sge, %623, %624 : vector<16x32xi32>
    %c-3_i32_250 = arith.constant -3 : i32
    %626 = vector.broadcast %c-3_i32_250 : i32 to vector<16x32xi32>
    %627 = arith.addi %16, %626 : vector<16x32xi32>
    %c16_i32_251 = arith.constant 16 : i32
    %628 = vector.broadcast %c16_i32_251 : i32 to vector<16x32xi32>
    %629 = arith.cmpi slt, %627, %628 : vector<16x32xi32>
    %630 = arith.andi %625, %629 : vector<16x32xi1>
    %cst_252 = arith.constant 0.000000e+00 : f32
    %631 = vector.broadcast %cst_252 : f32 to vector<16x32xf32>
    %632 = arith.select %630, %621, %631 : vector<16x32xi1>, vector<16x32xf32>
    %cst_253 = arith.constant 0.0996473804 : f32
    %633 = vector.broadcast %cst_253 : f32 to vector<16x32xf32>
    %634 = arith.mulf %632, %633 : vector<16x32xf32>
    %635 = arith.addf %618, %634 : vector<16x32xf32>
    %cst_254 = arith.constant 0.000000e+00 : f32
    %636 = vector.broadcast %cst_254 : f32 to vector<16x2xf32>
    %637 = vector.extract_strided_slice %617 {offsets = [0, 0], sizes = [16, 30], strides = [1, 1]} : vector<16x32xf32> to vector<16x30xf32>
    %638 = tpu.concatenate %636, %637 in 1 : vector<16x2xf32>, vector<16x30xf32> -> vector<16x32xf32>
    %c-2_i32_255 = arith.constant -2 : i32
    %639 = vector.broadcast %c-2_i32_255 : i32 to vector<16x32xi32>
    %640 = arith.addi %16, %639 : vector<16x32xi32>
    %c0_i32_256 = arith.constant 0 : i32
    %641 = vector.broadcast %c0_i32_256 : i32 to vector<16x32xi32>
    %642 = arith.cmpi sge, %640, %641 : vector<16x32xi32>
    %c-2_i32_257 = arith.constant -2 : i32
    %643 = vector.broadcast %c-2_i32_257 : i32 to vector<16x32xi32>
    %644 = arith.addi %16, %643 : vector<16x32xi32>
    %c16_i32_258 = arith.constant 16 : i32
    %645 = vector.broadcast %c16_i32_258 : i32 to vector<16x32xi32>
    %646 = arith.cmpi slt, %644, %645 : vector<16x32xi32>
    %647 = arith.andi %642, %646 : vector<16x32xi1>
    %cst_259 = arith.constant 0.000000e+00 : f32
    %648 = vector.broadcast %cst_259 : f32 to vector<16x32xf32>
    %649 = arith.select %647, %638, %648 : vector<16x32xi1>, vector<16x32xf32>
    %cst_260 = arith.constant 0.110778756 : f32
    %650 = vector.broadcast %cst_260 : f32 to vector<16x32xf32>
    %651 = arith.mulf %649, %650 : vector<16x32xf32>
    %652 = arith.addf %635, %651 : vector<16x32xf32>
    %cst_261 = arith.constant 0.000000e+00 : f32
    %653 = vector.broadcast %cst_261 : f32 to vector<16x1xf32>
    %654 = vector.extract_strided_slice %617 {offsets = [0, 0], sizes = [16, 31], strides = [1, 1]} : vector<16x32xf32> to vector<16x31xf32>
    %655 = tpu.concatenate %653, %654 in 1 : vector<16x1xf32>, vector<16x31xf32> -> vector<16x32xf32>
    %c-1_i32_262 = arith.constant -1 : i32
    %656 = vector.broadcast %c-1_i32_262 : i32 to vector<16x32xi32>
    %657 = arith.addi %16, %656 : vector<16x32xi32>
    %c0_i32_263 = arith.constant 0 : i32
    %658 = vector.broadcast %c0_i32_263 : i32 to vector<16x32xi32>
    %659 = arith.cmpi sge, %657, %658 : vector<16x32xi32>
    %c-1_i32_264 = arith.constant -1 : i32
    %660 = vector.broadcast %c-1_i32_264 : i32 to vector<16x32xi32>
    %661 = arith.addi %16, %660 : vector<16x32xi32>
    %c16_i32_265 = arith.constant 16 : i32
    %662 = vector.broadcast %c16_i32_265 : i32 to vector<16x32xi32>
    %663 = arith.cmpi slt, %661, %662 : vector<16x32xi32>
    %664 = arith.andi %659, %663 : vector<16x32xi1>
    %cst_266 = arith.constant 0.000000e+00 : f32
    %665 = vector.broadcast %cst_266 : f32 to vector<16x32xf32>
    %666 = arith.select %664, %655, %665 : vector<16x32xi1>, vector<16x32xf32>
    %cst_267 = arith.constant 0.110778756 : f32
    %667 = vector.broadcast %cst_267 : f32 to vector<16x32xf32>
    %668 = arith.mulf %666, %667 : vector<16x32xf32>
    %669 = arith.addf %652, %668 : vector<16x32xf32>
    %cst_268 = arith.constant 0.0450392477 : f32
    %670 = vector.broadcast %cst_268 : f32 to vector<16x32xf32>
    %671 = arith.mulf %617, %670 : vector<16x32xf32>
    %672 = arith.addf %669, %671 : vector<16x32xf32>
    %cst_269 = arith.constant -0.149156779 : f32
    %673 = vector.broadcast %cst_269 : f32 to vector<16x32xf32>
    %674 = arith.addf %672, %673 : vector<16x32xf32>
    %cst_270 = arith.constant 0.000000e+00 : f32
    %675 = vector.broadcast %cst_270 : f32 to vector<16x32xf32>
    %676 = arith.maximumf %674, %675 : vector<16x32xf32>
    %cst_271 = arith.constant 0.000000e+00 : f32
    %677 = vector.broadcast %cst_271 : f32 to vector<16x32xf32>
    %cst_272 = arith.constant 0.159691572 : f32
    %678 = vector.broadcast %cst_272 : f32 to vector<16x32xf32>
    %679 = arith.mulf %605, %678 : vector<16x32xf32>
    %680 = arith.addf %677, %679 : vector<16x32xf32>
    %cst_273 = arith.constant 1.000000e+00 : f32
    %681 = vector.broadcast %cst_273 : f32 to vector<16x32xf32>
    %682 = arith.mulf %501, %681 : vector<16x32xf32>
    %683 = arith.addf %680, %682 : vector<16x32xf32>
    %cst_274 = arith.constant 1.000000e+00 : f32
    %684 = vector.broadcast %cst_274 : f32 to vector<16x32xf32>
    %685 = arith.mulf %507, %684 : vector<16x32xf32>
    %686 = arith.addf %683, %685 : vector<16x32xf32>
    %cst_275 = arith.constant 0.645520031 : f32
    %687 = vector.broadcast %cst_275 : f32 to vector<16x32xf32>
    %688 = arith.mulf %497, %687 : vector<16x32xf32>
    %689 = arith.addf %686, %688 : vector<16x32xf32>
    %cst_276 = arith.constant 0.000000e+00 : f32
    %690 = vector.broadcast %cst_276 : f32 to vector<16x32xf32>
    %cst_277 = arith.constant 0.000000e+00 : f32
    %691 = vector.broadcast %cst_277 : f32 to vector<16x2xf32>
    %692 = vector.extract_strided_slice %689 {offsets = [0, 0], sizes = [16, 30], strides = [1, 1]} : vector<16x32xf32> to vector<16x30xf32>
    %693 = tpu.concatenate %691, %692 in 1 : vector<16x2xf32>, vector<16x30xf32> -> vector<16x32xf32>
    %c-2_i32_278 = arith.constant -2 : i32
    %694 = vector.broadcast %c-2_i32_278 : i32 to vector<16x32xi32>
    %695 = arith.addi %16, %694 : vector<16x32xi32>
    %c0_i32_279 = arith.constant 0 : i32
    %696 = vector.broadcast %c0_i32_279 : i32 to vector<16x32xi32>
    %697 = arith.cmpi sge, %695, %696 : vector<16x32xi32>
    %c-2_i32_280 = arith.constant -2 : i32
    %698 = vector.broadcast %c-2_i32_280 : i32 to vector<16x32xi32>
    %699 = arith.addi %16, %698 : vector<16x32xi32>
    %c16_i32_281 = arith.constant 16 : i32
    %700 = vector.broadcast %c16_i32_281 : i32 to vector<16x32xi32>
    %701 = arith.cmpi slt, %699, %700 : vector<16x32xi32>
    %702 = arith.andi %697, %701 : vector<16x32xi1>
    %cst_282 = arith.constant 0.000000e+00 : f32
    %703 = vector.broadcast %cst_282 : f32 to vector<16x32xf32>
    %704 = arith.select %702, %693, %703 : vector<16x32xi1>, vector<16x32xf32>
    %cst_283 = arith.constant 0.0110082077 : f32
    %705 = vector.broadcast %cst_283 : f32 to vector<16x32xf32>
    %706 = arith.mulf %704, %705 : vector<16x32xf32>
    %707 = arith.addf %690, %706 : vector<16x32xf32>
    %cst_284 = arith.constant 0.000000e+00 : f32
    %708 = vector.broadcast %cst_284 : f32 to vector<16x1xf32>
    %709 = vector.extract_strided_slice %689 {offsets = [0, 0], sizes = [16, 31], strides = [1, 1]} : vector<16x32xf32> to vector<16x31xf32>
    %710 = tpu.concatenate %708, %709 in 1 : vector<16x1xf32>, vector<16x31xf32> -> vector<16x32xf32>
    %c-1_i32_285 = arith.constant -1 : i32
    %711 = vector.broadcast %c-1_i32_285 : i32 to vector<16x32xi32>
    %712 = arith.addi %16, %711 : vector<16x32xi32>
    %c0_i32_286 = arith.constant 0 : i32
    %713 = vector.broadcast %c0_i32_286 : i32 to vector<16x32xi32>
    %714 = arith.cmpi sge, %712, %713 : vector<16x32xi32>
    %c-1_i32_287 = arith.constant -1 : i32
    %715 = vector.broadcast %c-1_i32_287 : i32 to vector<16x32xi32>
    %716 = arith.addi %16, %715 : vector<16x32xi32>
    %c16_i32_288 = arith.constant 16 : i32
    %717 = vector.broadcast %c16_i32_288 : i32 to vector<16x32xi32>
    %718 = arith.cmpi slt, %716, %717 : vector<16x32xi32>
    %719 = arith.andi %714, %718 : vector<16x32xi1>
    %cst_289 = arith.constant 0.000000e+00 : f32
    %720 = vector.broadcast %cst_289 : f32 to vector<16x32xf32>
    %721 = arith.select %719, %710, %720 : vector<16x32xi1>, vector<16x32xf32>
    %cst_290 = arith.constant 0.0830010995 : f32
    %722 = vector.broadcast %cst_290 : f32 to vector<16x32xf32>
    %723 = arith.mulf %721, %722 : vector<16x32xf32>
    %724 = arith.addf %707, %723 : vector<16x32xf32>
    %cst_291 = arith.constant 0.0830010995 : f32
    %725 = vector.broadcast %cst_291 : f32 to vector<16x32xf32>
    %726 = arith.mulf %689, %725 : vector<16x32xf32>
    %727 = arith.addf %724, %726 : vector<16x32xf32>
    %728 = vector.extract_strided_slice %689 {offsets = [0, 1], sizes = [16, 31], strides = [1, 1]} : vector<16x32xf32> to vector<16x31xf32>
    %cst_292 = arith.constant 0.000000e+00 : f32
    %729 = vector.broadcast %cst_292 : f32 to vector<16x1xf32>
    %730 = tpu.concatenate %728, %729 in 1 : vector<16x31xf32>, vector<16x1xf32> -> vector<16x32xf32>
    %c1_i32_293 = arith.constant 1 : i32
    %731 = vector.broadcast %c1_i32_293 : i32 to vector<16x32xi32>
    %732 = arith.addi %16, %731 : vector<16x32xi32>
    %c0_i32_294 = arith.constant 0 : i32
    %733 = vector.broadcast %c0_i32_294 : i32 to vector<16x32xi32>
    %734 = arith.cmpi sge, %732, %733 : vector<16x32xi32>
    %c1_i32_295 = arith.constant 1 : i32
    %735 = vector.broadcast %c1_i32_295 : i32 to vector<16x32xi32>
    %736 = arith.addi %16, %735 : vector<16x32xi32>
    %c16_i32_296 = arith.constant 16 : i32
    %737 = vector.broadcast %c16_i32_296 : i32 to vector<16x32xi32>
    %738 = arith.cmpi slt, %736, %737 : vector<16x32xi32>
    %739 = arith.andi %734, %738 : vector<16x32xi1>
    %cst_297 = arith.constant 0.000000e+00 : f32
    %740 = vector.broadcast %cst_297 : f32 to vector<16x32xf32>
    %741 = arith.select %739, %730, %740 : vector<16x32xi1>, vector<16x32xf32>
    %cst_298 = arith.constant 0.0830010995 : f32
    %742 = vector.broadcast %cst_298 : f32 to vector<16x32xf32>
    %743 = arith.mulf %741, %742 : vector<16x32xf32>
    %744 = arith.addf %727, %743 : vector<16x32xf32>
    %745 = vector.extract_strided_slice %689 {offsets = [0, 2], sizes = [16, 30], strides = [1, 1]} : vector<16x32xf32> to vector<16x30xf32>
    %cst_299 = arith.constant 0.000000e+00 : f32
    %746 = vector.broadcast %cst_299 : f32 to vector<16x2xf32>
    %747 = tpu.concatenate %745, %746 in 1 : vector<16x30xf32>, vector<16x2xf32> -> vector<16x32xf32>
    %c2_i32 = arith.constant 2 : i32
    %748 = vector.broadcast %c2_i32 : i32 to vector<16x32xi32>
    %749 = arith.addi %16, %748 : vector<16x32xi32>
    %c0_i32_300 = arith.constant 0 : i32
    %750 = vector.broadcast %c0_i32_300 : i32 to vector<16x32xi32>
    %751 = arith.cmpi sge, %749, %750 : vector<16x32xi32>
    %c2_i32_301 = arith.constant 2 : i32
    %752 = vector.broadcast %c2_i32_301 : i32 to vector<16x32xi32>
    %753 = arith.addi %16, %752 : vector<16x32xi32>
    %c16_i32_302 = arith.constant 16 : i32
    %754 = vector.broadcast %c16_i32_302 : i32 to vector<16x32xi32>
    %755 = arith.cmpi slt, %753, %754 : vector<16x32xi32>
    %756 = arith.andi %751, %755 : vector<16x32xi1>
    %cst_303 = arith.constant 0.000000e+00 : f32
    %757 = vector.broadcast %cst_303 : f32 to vector<16x32xf32>
    %758 = arith.select %756, %747, %757 : vector<16x32xi1>, vector<16x32xf32>
    %cst_304 = arith.constant 0.0830010995 : f32
    %759 = vector.broadcast %cst_304 : f32 to vector<16x32xf32>
    %760 = arith.mulf %758, %759 : vector<16x32xf32>
    %761 = arith.addf %744, %760 : vector<16x32xf32>
    %762 = vector.extract_strided_slice %689 {offsets = [0, 3], sizes = [16, 29], strides = [1, 1]} : vector<16x32xf32> to vector<16x29xf32>
    %cst_305 = arith.constant 0.000000e+00 : f32
    %763 = vector.broadcast %cst_305 : f32 to vector<16x3xf32>
    %764 = tpu.concatenate %762, %763 in 1 : vector<16x29xf32>, vector<16x3xf32> -> vector<16x32xf32>
    %c3_i32 = arith.constant 3 : i32
    %765 = vector.broadcast %c3_i32 : i32 to vector<16x32xi32>
    %766 = arith.addi %16, %765 : vector<16x32xi32>
    %c0_i32_306 = arith.constant 0 : i32
    %767 = vector.broadcast %c0_i32_306 : i32 to vector<16x32xi32>
    %768 = arith.cmpi sge, %766, %767 : vector<16x32xi32>
    %c3_i32_307 = arith.constant 3 : i32
    %769 = vector.broadcast %c3_i32_307 : i32 to vector<16x32xi32>
    %770 = arith.addi %16, %769 : vector<16x32xi32>
    %c16_i32_308 = arith.constant 16 : i32
    %771 = vector.broadcast %c16_i32_308 : i32 to vector<16x32xi32>
    %772 = arith.cmpi slt, %770, %771 : vector<16x32xi32>
    %773 = arith.andi %768, %772 : vector<16x32xi1>
    %cst_309 = arith.constant 0.000000e+00 : f32
    %774 = vector.broadcast %cst_309 : f32 to vector<16x32xf32>
    %775 = arith.select %773, %764, %774 : vector<16x32xi1>, vector<16x32xf32>
    %cst_310 = arith.constant 0.0830010995 : f32
    %776 = vector.broadcast %cst_310 : f32 to vector<16x32xf32>
    %777 = arith.mulf %775, %776 : vector<16x32xf32>
    %778 = arith.addf %761, %777 : vector<16x32xf32>
    %779 = vector.extract_strided_slice %689 {offsets = [0, 4], sizes = [16, 28], strides = [1, 1]} : vector<16x32xf32> to vector<16x28xf32>
    %cst_311 = arith.constant 0.000000e+00 : f32
    %780 = vector.broadcast %cst_311 : f32 to vector<16x4xf32>
    %781 = tpu.concatenate %779, %780 in 1 : vector<16x28xf32>, vector<16x4xf32> -> vector<16x32xf32>
    %c4_i32 = arith.constant 4 : i32
    %782 = vector.broadcast %c4_i32 : i32 to vector<16x32xi32>
    %783 = arith.addi %16, %782 : vector<16x32xi32>
    %c0_i32_312 = arith.constant 0 : i32
    %784 = vector.broadcast %c0_i32_312 : i32 to vector<16x32xi32>
    %785 = arith.cmpi sge, %783, %784 : vector<16x32xi32>
    %c4_i32_313 = arith.constant 4 : i32
    %786 = vector.broadcast %c4_i32_313 : i32 to vector<16x32xi32>
    %787 = arith.addi %16, %786 : vector<16x32xi32>
    %c16_i32_314 = arith.constant 16 : i32
    %788 = vector.broadcast %c16_i32_314 : i32 to vector<16x32xi32>
    %789 = arith.cmpi slt, %787, %788 : vector<16x32xi32>
    %790 = arith.andi %785, %789 : vector<16x32xi1>
    %cst_315 = arith.constant 0.000000e+00 : f32
    %791 = vector.broadcast %cst_315 : f32 to vector<16x32xf32>
    %792 = arith.select %790, %781, %791 : vector<16x32xi1>, vector<16x32xf32>
    %cst_316 = arith.constant 0.00342585263 : f32
    %793 = vector.broadcast %cst_316 : f32 to vector<16x32xf32>
    %794 = arith.mulf %792, %793 : vector<16x32xf32>
    %795 = arith.addf %778, %794 : vector<16x32xf32>
    %cst_317 = arith.constant 0.158480242 : f32
    %796 = vector.broadcast %cst_317 : f32 to vector<16x32xf32>
    %797 = arith.addf %795, %796 : vector<16x32xf32>
    %cst_318 = arith.constant 0.000000e+00 : f32
    %798 = vector.broadcast %cst_318 : f32 to vector<16x32xf32>
    %799 = arith.maximumf %797, %798 : vector<16x32xf32>
    %cst_319 = arith.constant 0.000000e+00 : f32
    %800 = vector.broadcast %cst_319 : f32 to vector<16x32xf32>
    %cst_320 = arith.constant 0.172495961 : f32
    %801 = vector.broadcast %cst_320 : f32 to vector<16x32xf32>
    %802 = arith.mulf %501, %801 : vector<16x32xf32>
    %803 = arith.addf %800, %802 : vector<16x32xf32>
    %cst_321 = arith.constant 1.000000e+00 : f32
    %804 = vector.broadcast %cst_321 : f32 to vector<16x32xf32>
    %805 = arith.mulf %507, %804 : vector<16x32xf32>
    %806 = arith.addf %803, %805 : vector<16x32xf32>
    %cst_322 = arith.constant 1.000000e+00 : f32
    %807 = vector.broadcast %cst_322 : f32 to vector<16x32xf32>
    %808 = arith.mulf %497, %807 : vector<16x32xf32>
    %809 = arith.addf %806, %808 : vector<16x32xf32>
    %cst_323 = arith.constant 0.845420956 : f32
    %810 = vector.broadcast %cst_323 : f32 to vector<16x32xf32>
    %811 = arith.mulf %516, %810 : vector<16x32xf32>
    %812 = arith.addf %809, %811 : vector<16x32xf32>
    %cst_324 = arith.constant 0.000000e+00 : f32
    %813 = vector.broadcast %cst_324 : f32 to vector<16x32xf32>
    %cst_325 = arith.constant 0.000000e+00 : f32
    %814 = vector.broadcast %cst_325 : f32 to vector<16x3xf32>
    %815 = vector.extract_strided_slice %812 {offsets = [0, 0], sizes = [16, 29], strides = [1, 1]} : vector<16x32xf32> to vector<16x29xf32>
    %816 = tpu.concatenate %814, %815 in 1 : vector<16x3xf32>, vector<16x29xf32> -> vector<16x32xf32>
    %c-3_i32_326 = arith.constant -3 : i32
    %817 = vector.broadcast %c-3_i32_326 : i32 to vector<16x32xi32>
    %818 = arith.addi %16, %817 : vector<16x32xi32>
    %c0_i32_327 = arith.constant 0 : i32
    %819 = vector.broadcast %c0_i32_327 : i32 to vector<16x32xi32>
    %820 = arith.cmpi sge, %818, %819 : vector<16x32xi32>
    %c-3_i32_328 = arith.constant -3 : i32
    %821 = vector.broadcast %c-3_i32_328 : i32 to vector<16x32xi32>
    %822 = arith.addi %16, %821 : vector<16x32xi32>
    %c16_i32_329 = arith.constant 16 : i32
    %823 = vector.broadcast %c16_i32_329 : i32 to vector<16x32xi32>
    %824 = arith.cmpi slt, %822, %823 : vector<16x32xi32>
    %825 = arith.andi %820, %824 : vector<16x32xi1>
    %cst_330 = arith.constant 0.000000e+00 : f32
    %826 = vector.broadcast %cst_330 : f32 to vector<16x32xf32>
    %827 = arith.select %825, %816, %826 : vector<16x32xi1>, vector<16x32xf32>
    %cst_331 = arith.constant 0.0900846421 : f32
    %828 = vector.broadcast %cst_331 : f32 to vector<16x32xf32>
    %829 = arith.mulf %827, %828 : vector<16x32xf32>
    %830 = arith.addf %813, %829 : vector<16x32xf32>
    %cst_332 = arith.constant 0.000000e+00 : f32
    %831 = vector.broadcast %cst_332 : f32 to vector<16x2xf32>
    %832 = vector.extract_strided_slice %812 {offsets = [0, 0], sizes = [16, 30], strides = [1, 1]} : vector<16x32xf32> to vector<16x30xf32>
    %833 = tpu.concatenate %831, %832 in 1 : vector<16x2xf32>, vector<16x30xf32> -> vector<16x32xf32>
    %c-2_i32_333 = arith.constant -2 : i32
    %834 = vector.broadcast %c-2_i32_333 : i32 to vector<16x32xi32>
    %835 = arith.addi %16, %834 : vector<16x32xi32>
    %c0_i32_334 = arith.constant 0 : i32
    %836 = vector.broadcast %c0_i32_334 : i32 to vector<16x32xi32>
    %837 = arith.cmpi sge, %835, %836 : vector<16x32xi32>
    %c-2_i32_335 = arith.constant -2 : i32
    %838 = vector.broadcast %c-2_i32_335 : i32 to vector<16x32xi32>
    %839 = arith.addi %16, %838 : vector<16x32xi32>
    %c16_i32_336 = arith.constant 16 : i32
    %840 = vector.broadcast %c16_i32_336 : i32 to vector<16x32xi32>
    %841 = arith.cmpi slt, %839, %840 : vector<16x32xi32>
    %842 = arith.andi %837, %841 : vector<16x32xi1>
    %cst_337 = arith.constant 0.000000e+00 : f32
    %843 = vector.broadcast %cst_337 : f32 to vector<16x32xf32>
    %844 = arith.select %842, %833, %843 : vector<16x32xi1>, vector<16x32xf32>
    %cst_338 = arith.constant 0.0959525555 : f32
    %845 = vector.broadcast %cst_338 : f32 to vector<16x32xf32>
    %846 = arith.mulf %844, %845 : vector<16x32xf32>
    %847 = arith.addf %830, %846 : vector<16x32xf32>
    %cst_339 = arith.constant 0.000000e+00 : f32
    %848 = vector.broadcast %cst_339 : f32 to vector<16x1xf32>
    %849 = vector.extract_strided_slice %812 {offsets = [0, 0], sizes = [16, 31], strides = [1, 1]} : vector<16x32xf32> to vector<16x31xf32>
    %850 = tpu.concatenate %848, %849 in 1 : vector<16x1xf32>, vector<16x31xf32> -> vector<16x32xf32>
    %c-1_i32_340 = arith.constant -1 : i32
    %851 = vector.broadcast %c-1_i32_340 : i32 to vector<16x32xi32>
    %852 = arith.addi %16, %851 : vector<16x32xi32>
    %c0_i32_341 = arith.constant 0 : i32
    %853 = vector.broadcast %c0_i32_341 : i32 to vector<16x32xi32>
    %854 = arith.cmpi sge, %852, %853 : vector<16x32xi32>
    %c-1_i32_342 = arith.constant -1 : i32
    %855 = vector.broadcast %c-1_i32_342 : i32 to vector<16x32xi32>
    %856 = arith.addi %16, %855 : vector<16x32xi32>
    %c16_i32_343 = arith.constant 16 : i32
    %857 = vector.broadcast %c16_i32_343 : i32 to vector<16x32xi32>
    %858 = arith.cmpi slt, %856, %857 : vector<16x32xi32>
    %859 = arith.andi %854, %858 : vector<16x32xi1>
    %cst_344 = arith.constant 0.000000e+00 : f32
    %860 = vector.broadcast %cst_344 : f32 to vector<16x32xf32>
    %861 = arith.select %859, %850, %860 : vector<16x32xi1>, vector<16x32xf32>
    %cst_345 = arith.constant 0.0915435553 : f32
    %862 = vector.broadcast %cst_345 : f32 to vector<16x32xf32>
    %863 = arith.mulf %861, %862 : vector<16x32xf32>
    %864 = arith.addf %847, %863 : vector<16x32xf32>
    %cst_346 = arith.constant -0.0184737463 : f32
    %865 = vector.broadcast %cst_346 : f32 to vector<16x32xf32>
    %866 = arith.addf %864, %865 : vector<16x32xf32>
    %cst_347 = arith.constant 0.000000e+00 : f32
    %867 = vector.broadcast %cst_347 : f32 to vector<16x32xf32>
    %868 = arith.maximumf %866, %867 : vector<16x32xf32>
    %869 = tpu.concatenate %601, %676, %799, %868 in 1 : vector<16x32xf32>, vector<16x32xf32>, vector<16x32xf32>, vector<16x32xf32> -> vector<16x128xf32>
    %c0_348 = arith.constant 0 : index
    %c0_349 = arith.constant 0 : index
    %870 = vector.load %arg1[%c0_348, %c0_349] : memref<16x128xf32, #tpu.memory_space<vmem>>, vector<16x128xf32>
    tpu.vector_store %arg1[%c0_348, %c0_349], %869 {strides = array<i32>} : memref<16x128xf32, #tpu.memory_space<vmem>>, vector<16x128xf32>,
    return
  }
}

</mosaic_0001>

<bundles_post_ra>
// kernel: tpu_custom_call.1
= control target key start
LH: loop header
LB: loop body
LE: loop exit
PB: predicated region body
PF: predicated region fallthrough
CT: control target
= control target key end

     0   :  { %6 = vsyncpa [#allocation3], 0  ;;  %s1597_s0 = inlined_call_operand.hbm [shape: f32[4,16,32], index: 0, kind: input, shape index: {}]   ;;  %s1598_s1 = inlined_call_operand.hbm [shape: f32[16,128], index: 1, kind: output, shape index: {}]  }
   0x1   :  { %7 = vsyncpa [#allocation4], 0  ;;  %s996_s6 = smov [#allocation2]   ;;  %s948_s10 = scalar_lea.hbm %s1597_s0, 1024 }
   0x2   :  { %s13_s7 = sshll.u32 %s996_s6, 4  ;;  %p949_p0 = scmp.ne.s32.totalorder %s1597_s0, %s948_s10  ;;  %s14_s7 = int_to_ptr.vmem [resolvable:$true] %s13_s7 }
   0x3   :  { %p952_p1 = scmp.lt.u32.totalorder %s948_s10, %s1597_s0 }
   0x5   :  { %p954_p2 = pnand %p952_p1, %p949_p0 }
   0x7   :  { %957 = shalt.err (!%p954_p2)
}
   0x8   :  { %s958_s15 = scalar_lea.vmem %s14_s7, 1024  ;;  %p963_p4 = scmp.lt.s32.totalorder %s14_s7, %s14_s7 }
   0x9   :  { %p959_p3 = scmp.ne.s32.totalorder %s14_s7, %s958_s15  ;;  %p964_p5 = scmp.lt.s32.totalorder %s958_s15, %s958_s15 }
   0xb   :  { %p965_p6 = por %p964_p5, %p963_p4 }
   0xd   :  { %p966_p7 = pnand %p965_p6, %p959_p3 }
   0xf   :  { %969 = shalt.err (!%p966_p7)
}
  0x10   :  { %s997_s16 = smov 128   ;;  %s998_s17 = smov 8  }
  0x11   :  { %19 = dma.hbm_to_vmem [thread:$0]  %s1597_s0, 1024, %s14_s7, [#allocation3], %s997_s16, %s997_s16, %s998_s17  }
  0x12   :  { %992 = dma.done.wait [#allocation3], 1024  }
  0x13   :  { %993 = vsyncadd [#allocation3], 4294966272  ;;  %v1035_v0 = vld [vmem:[#allocation2 + $0x8] sm:$0xff]  ;;  %v1037_v1 = vld [vmem:[#allocation2] sm:$0xff]  ;;  %vm41_vm0 = vcmask 1040384   ;;  %s999_s20 = smov 1   ;;  %v23_v40 = vlaneseq }
  0x14   :  { %93 = vrot.lane.b32.xlu1 %v1035_v0, %s999_s20  ;;  %91 = vrot.lane.b32.xlu0 %v1037_v1, %s999_s20  ;;  %v42_v2 = vrot.slane %v1037_v1, 7  ;;  %v43_v3 = vrot.slane %v1035_v0, 7  ;;  %s1000_s0 = smov 127   ;;  %v125_v6 = vrot.slane %v1035_v0, 1  ;;  %v124_v7 = vrot.slane %v1037_v1, 1  ;;  %v1071_v10 = vld [vmem:[#allocation2 + $0x10] sm:$0xff] }
  0x15   :  { %vm123_vm1 = vcmask 1046528   ;;  %v1073_v11 = vld [vmem:[#allocation2 + $0x18] sm:$0xff]  ;;  %v168_v12 = vrot.slane %v1071_v10, 7  ;;  %v239_v17 = vrot.slane %v1071_v10, 1  ;;  %v1115_v20 = vld [vmem:[#allocation2 + $0x20] sm:$0xff]  ;;  %v1117_v21 = vld [vmem:[#allocation2 + $0x28] sm:$0xff] }
  0x16   :  { %v1046_v4 = vsel %vm41_vm0, 0.0, %v42_v2  ;;  %v1053_v5 = vsel %vm41_vm0, %v42_v2, %v43_v3  ;;  %v1066_v8 = vsel %vm123_vm1, %v125_v6, 0.0  ;;  %v1069_v9 = vsel %vm123_vm1, %v124_v7, %v125_v6  ;;  %v1159_v30 = vld [vmem:[#allocation2 + $0x30] sm:$0xff]  ;;  %v1161_v31 = vld [vmem:[#allocation2 + $0x38] sm:$0xff]  ;;  %s1001_s21 = smov 2   ;;  %s1002_s22 = smov 3  }
  0x17   :  { %v169_v13 = vrot.slane %v1073_v11, 7  ;;  %v1089_v15 = vsel %vm41_vm0, 0.0, %v168_v12  ;;  %v240_v16 = vrot.slane %v1073_v11, 1  ;;  %v283_v22 = vrot.slane %v1115_v20, 7  ;;  %s1003_s23 = smov 126   ;;  %s1004_s24 = smov 125  }
  0x18   :  { %72 = vrot.lane.b32.xlu1 %v1046_v4, %s1000_s0  ;;  %49 = vrot.lane.b32.xlu0 %v1046_v4, %s999_s20  ;;  %v284_v23 = vrot.slane %v1117_v21, 7  ;;  %v355_v26 = vrot.slane %v1117_v21, 1  ;;  %v354_v27 = vrot.slane %v1115_v20, 1  ;;  %v398_v32 = vrot.slane %v1159_v30, 7  ;;  %s1005_s25 = smov 124   ;;  %s1006_s26 = smov 32  }
  0x19   :  { %v1086_v14 = vsel %vm41_vm0, %v168_v12, %v169_v13  ;;  %v1110_v18 = vsel %vm123_vm1, %v240_v16, 0.0  ;;  %v1113_v19 = vsel %vm123_vm1, %v239_v17, %v240_v16  ;;  %v1133_v25 = vsel %vm41_vm0, 0.0, %v283_v22  ;;  %s1007_s27 = smov 64   ;;  %s1008_s28 = smov 96  }
  0x1a   :  { %v1130_v24 = vsel %vm41_vm0, %v283_v22, %v284_v23  ;;  %v1154_v28 = vsel %vm123_vm1, %v355_v26, 0.0  ;;  %v1157_v29 = vsel %vm123_vm1, %v354_v27, %v355_v26  ;;  %v399_v33 = vrot.slane %v1161_v31, 7  ;;  %s1009_s29 = smov [#allocation5]  }
  0x1b   :  { %v1177_v35 = vsel %vm41_vm0, 0.0, %v398_v32  ;;  %v470_v36 = vrot.slane %v1161_v31, 1  ;;  %v469_v37 = vrot.slane %v1159_v30, 1  ;;  %v24_v41 = vand.u32 127, %v23_v40  ;;  %s922_s30 = sshll.u32 %s1009_s29, 4  ;;  %s923_s30 = int_to_ptr.vmem [resolvable:$true] %s922_s30 }
  0x1c   :  { %74 = vrot.lane.b32.xlu1 %v1053_v5, %s1000_s0  ;;  %51 = vrot.lane.b32.xlu0 %v1053_v5, %s999_s20  ;;  %v1174_v34 = vsel %vm41_vm0, %v398_v32, %v399_v33  ;;  %vm55_vm2 = vcmask 7168   ;;  %vm78_vm3 = vcmask 252928   ;;  %v68_v47 = vmul.f32 -0.43143556, %v1046_v4  ;;  %s970_s2 = scalar_lea.vmem %s923_s30, 256  ;;  %p975_p9 = scmp.lt.s32.totalorder %s923_s30, %s923_s30 }
  0x1d   :  { %v1198_v38 = vsel %vm123_vm1, %v470_v36, 0.0  ;;  %v1201_v39 = vsel %vm123_vm1, %v469_v37, %v470_v36  ;;  %v1211_v42 = vand.u32 15, %v24_v41  ;;  %v69_v56 = vmul.f32 -0.43143556, %v1053_v5  ;;  %p971_p8 = scmp.ne.s32.totalorder %s923_s30, %s970_s2  ;;  %p976_p10 = scmp.lt.s32.totalorder %s970_s2, %s970_s2 }
  0x1e   :  { %v105_v12 = vmul.f32 -0.16149032, %v1037_v1  ;;  %v106_v33 = vmul.f32 -0.16149032, %v1035_v0  ;;  %vm514_vm6 = vcmask 1041408   ;;  %vm630_vm7 = vcmask 1042432  }
  0x1f   :  { %v1214_v43 = vadd.s32 1, %v1211_v42  ;;  %v1217_v46 = vadd.s32 4294967295, %v1211_v42  ;;  %vm543_vm8 = vcmask 1045504   ;;  %vm581_vm9 = vcmask 15360   ;;  %p977_p11 = por %p976_p10, %p975_p9 }
  0x20   :  { %111 = vrot.lane.b32.xlu1 %v1035_v0, %s1000_s0  ;;  %109 = vrot.lane.b32.xlu0 %v1037_v1, %s1000_s0  ;;  %vm562_vm10 = vcmask 23552   ;;  %vm767_vm13 = vcmask 244736   ;;  %vm786_vm14 = vcmask 236544  }
  0x21   :  { %vm83_vm4 = vcmp.lt.s32.totalorder %v1214_v43, 16  ;;  %vm59_vm5 = vcmp.ge.s32.totalorder %v1217_v46, 0  ;;  %p978_p12 = pnand %p977_p11, %p971_p8 }
  0x24   :  { %133 = vrot.lane.b32.xlu1 %v1066_v8, %s999_s20  ;;  %131 = vrot.lane.b32.xlu0 %v1069_v9, %s999_s20 }
  0x28   :  { %151 = vrot.lane.b32.xlu1 %v1066_v8, %s1000_s0  ;;  %149 = vrot.lane.b32.xlu0 %v1069_v9, %s1000_s0 }
  0x2c   :  { %177 = vrot.lane.b32.xlu1 %v1086_v14, %s999_s20  ;;  %175 = vrot.lane.b32.xlu0 %v1089_v15, %s999_s20 }
  0x30   :  { %195 = vrot.lane.b32.xlu1 %v1086_v14, %s1000_s0  ;;  %193 = vrot.lane.b32.xlu0 %v1089_v15, %s1000_s0 }
  0x34   :  { %209 = vrot.lane.b32.xlu1 %v1073_v11, %s999_s20  ;;  %207 = vrot.lane.b32.xlu0 %v1071_v10, %s999_s20 }
  0x38   :  { %227 = vrot.lane.b32.xlu1 %v1073_v11, %s1000_s0  ;;  %225 = vrot.lane.b32.xlu0 %v1071_v10, %s1000_s0 }
  0x3c   :  { %248 = vrot.lane.b32.xlu1 %v1110_v18, %s999_s20  ;;  %246 = vrot.lane.b32.xlu0 %v1113_v19, %s999_s20 }
  0x40   :  { %266 = vrot.lane.b32.xlu1 %v1110_v18, %s1000_s0  ;;  %264 = vrot.lane.b32.xlu0 %v1113_v19, %s1000_s0 }
  0x44   :  { %292 = vrot.lane.b32.xlu1 %v1130_v24, %s999_s20  ;;  %290 = vrot.lane.b32.xlu0 %v1133_v25, %s999_s20 }
  0x48   :  { %310 = vrot.lane.b32.xlu1 %v1130_v24, %s1000_s0  ;;  %308 = vrot.lane.b32.xlu0 %v1133_v25, %s1000_s0 }
  0x4c   :  { %324 = vrot.lane.b32.xlu1 %v1117_v21, %s999_s20  ;;  %322 = vrot.lane.b32.xlu0 %v1115_v20, %s999_s20 }
  0x50   :  { %342 = vrot.lane.b32.xlu1 %v1117_v21, %s1000_s0  ;;  %340 = vrot.lane.b32.xlu0 %v1115_v20, %s1000_s0 }
  0x54   :  { %363 = vrot.lane.b32.xlu1 %v1154_v28, %s999_s20  ;;  %361 = vrot.lane.b32.xlu0 %v1157_v29, %s999_s20 }
  0x58   :  { %381 = vrot.lane.b32.xlu1 %v1154_v28, %s1000_s0  ;;  %379 = vrot.lane.b32.xlu0 %v1157_v29, %s1000_s0 }
  0x5c   :  { %407 = vrot.lane.b32.xlu1 %v1174_v34, %s999_s20  ;;  %405 = vrot.lane.b32.xlu0 %v1177_v35, %s999_s20 }
  0x60   :  { %425 = vrot.lane.b32.xlu1 %v1174_v34, %s1000_s0  ;;  %423 = vrot.lane.b32.xlu0 %v1177_v35, %s1000_s0 }
  0x64   :  { %439 = vrot.lane.b32.xlu1 %v1161_v31, %s999_s20  ;;  %437 = vrot.lane.b32.xlu0 %v1159_v30, %s999_s20 }
  0x68   :  { %457 = vrot.lane.b32.xlu1 %v1161_v31, %s1000_s0  ;;  %455 = vrot.lane.b32.xlu0 %v1159_v30, %s1000_s0 }
  0x6c   :  { %478 = vrot.lane.b32.xlu1 %v1198_v38, %s999_s20  ;;  %476 = vrot.lane.b32.xlu0 %v1201_v39, %s999_s20 }
  0x70   :  { %496 = vrot.lane.b32.xlu1 %v1198_v38, %s1000_s0  ;;  %494 = vrot.lane.b32.xlu0 %v1201_v39, %s1000_s0 }
  0x86   :  { %v94_v44 = vpop.permute.xlu1 %93  ;;  %v92_v45 = vpop.permute.xlu0 %91 }
  0x87   :  { %v97_v50 = vsel %vm55_vm2, 0.0, %v92_v45  ;;  %v98_v57 = vsel %vm55_vm2, 0.0, %v94_v44 }
  0x88   :  { %v99_v58 = vsel %vm59_vm5, %v97_v50, 0.0  ;;  %v100_v13 = vsel %vm59_vm5, %v98_v57, 0.0  ;;  %v146_v57 = vmul.f32 0.06298036, %v1066_v8 }
  0x89   :  { %v101_v5 = vmul.f32 -0.07493029, %v99_v58  ;;  %v102_v37 = vmul.f32 -0.07493029, %v100_v13 }
  0x8a   :  { %v73_v48 = vpop.permute.xlu1 %72  ;;  %v50_v49 = vpop.permute.xlu0 %49 }
  0x8b   :  { %v79_v51 = vsel %vm78_vm3, %v73_v48, 0.0  ;;  %v56_v52 = vsel %vm55_vm2, 0.0, %v50_v49 }
  0x8c   :  { %v85_v53 = vsel %vm83_vm4, %v79_v51, 0.0  ;;  %v62_v54 = vsel %vm59_vm5, %v56_v52, 0.0  ;;  %v145_v51 = vmul.f32 0.06298036, %v1069_v9 }
  0x8d   :  { %v64_v55 = vmul.f32 -0.5176462, %v62_v54  ;;  %v87_v61 = vmul.f32 0.043562382, %v85_v53 }
  0x8e   :  { %v75_v59 = vpop.permute.xlu1 %74  ;;  %v52_v60 = vpop.permute.xlu0 %51 }
  0x8f   :  { %v70_v62 = vadd.f32 %v68_v47, %v64_v55  ;;  %v80_v63 = vsel %vm78_vm3, %v75_v59, 0.0  ;;  %v57_v2 = vsel %vm55_vm2, 0.0, %v52_v60 }
  0x90   :  { %v86_v3 = vsel %vm83_vm4, %v80_v63, 0.0  ;;  %v63_v4 = vsel %vm59_vm5, %v57_v2, 0.0 }
  0x91   :  { %v89_v6 = vadd.f32 %v87_v61, %v70_v62  ;;  %v65_v7 = vmul.f32 -0.5176462, %v63_v4  ;;  %v88_v16 = vmul.f32 0.043562382, %v86_v3 }
  0x92   :  { %v112_v17 = vpop.permute.xlu1 %111  ;;  %v110_v22 = vpop.permute.xlu0 %109 }
  0x93   :  { %v71_v23 = vadd.f32 %v69_v56, %v65_v7  ;;  %v116_v26 = vsel %vm78_vm3, %v112_v17, 0.0  ;;  %v103_v27 = vadd.f32 %v101_v5, %v89_v6  ;;  %v115_v32 = vsel %vm78_vm3, %v110_v22, 0.0 }
  0x94   :  { %v117_v36 = vsel %vm83_vm4, %v115_v32, 0.0  ;;  %v118_v44 = vsel %vm83_vm4, %v116_v26, 0.0  ;;  %v190_v22 = vmul.f32 -0.040177353, %v1086_v14 }
  0x95   :  { %v90_v40 = vadd.f32 %v88_v16, %v71_v23  ;;  %v107_v1 = vadd.f32 %v105_v12, %v103_v27  ;;  %v119_v41 = vmul.f32 -0.24977848, %v117_v36  ;;  %v120_v54 = vmul.f32 -0.24977848, %v118_v44 }
  0x96   :  { %v134_v45 = vpop.permute.xlu1 %133  ;;  %v132_v47 = vpop.permute.xlu0 %131  ;;  %v189_v23 = vmul.f32 -0.040177353, %v1089_v15 }
  0x97   :  { %v104_v48 = vadd.f32 %v102_v37, %v90_v40  ;;  %v138_v49 = vsel %vm55_vm2, 0.0, %v134_v45  ;;  %v137_v50 = vsel %vm55_vm2, 0.0, %v132_v47  ;;  %v121_v55 = vadd.f32 %v119_v41, %v107_v1 }
  0x98   :  { %v140_v0 = vsel %vm59_vm5, %v138_v49, 0.0  ;;  %v139_v52 = vsel %vm59_vm5, %v137_v50, 0.0 }
  0x99   :  { %v108_v53 = vadd.f32 %v106_v33, %v104_v48  ;;  %v141_v56 = vmul.f32 -0.24334997, %v139_v52  ;;  %v142_v58 = vmul.f32 -0.24334997, %v140_v0 }
  0x9a   :  { %v152_v59 = vpop.permute.xlu1 %151  ;;  %v150_v60 = vpop.permute.xlu0 %149 }
  0x9b   :  { %v122_v61 = vadd.f32 %v120_v54, %v108_v53  ;;  %v143_v62 = vadd.f32 %v141_v56, %v121_v55  ;;  %v156_v63 = vsel %vm78_vm3, %v152_v59, 0.0  ;;  %v155_v9 = vsel %vm78_vm3, %v150_v60, 0.0 }
  0x9c   :  { %v158_v2 = vsel %vm83_vm4, %v156_v63, 0.0  ;;  %v157_v3 = vsel %vm83_vm4, %v155_v9, 0.0 }
  0x9d   :  { %v144_v4 = vadd.f32 %v142_v58, %v122_v61  ;;  %v147_v5 = vadd.f32 %v145_v51, %v143_v62  ;;  %v159_v6 = vmul.f32 -0.27775076, %v157_v3  ;;  %v160_v13 = vmul.f32 -0.27775076, %v158_v2 }
  0x9e   :  { %v178_v7 = vpop.permute.xlu1 %177  ;;  %v176_v8 = vpop.permute.xlu0 %175  ;;  %v221_v58 = vmul.f32 -0.15867576, %v1071_v10 }
  0x9f   :  { %v148_v12 = vadd.f32 %v146_v57, %v144_v4  ;;  %v182_v16 = vsel %vm55_vm2, 0.0, %v178_v7  ;;  %v181_v17 = vsel %vm55_vm2, 0.0, %v176_v8  ;;  %v161_v33 = vadd.f32 %v159_v6, %v147_v5 }
  0xa0   :  { %v184_v26 = vsel %vm59_vm5, %v182_v16, 0.0  ;;  %v183_v27 = vsel %vm59_vm5, %v181_v17, 0.0  ;;  %v222_v57 = vmul.f32 -0.15867576, %v1073_v11 }
  0xa1   :  { %v162_v32 = vadd.f32 %v160_v13, %v148_v12  ;;  %v186_v36 = vmul.f32 0.45146826, %v184_v26  ;;  %v185_v37 = vmul.f32 0.45146826, %v183_v27  ;;  %v260_v26 = vmul.f32 -0.25226825, %v1113_v19 }
  0xa2   :  { %v196_v40 = vpop.permute.xlu1 %195  ;;  %v194_v1 = vpop.permute.xlu0 %193 }
  0xa3   :  { %v188_v41 = vadd.f32 %v186_v36, %v162_v32  ;;  %v187_v44 = vadd.f32 %v185_v37, %v161_v33  ;;  %v200_v45 = vsel %vm78_vm3, %v196_v40, 0.0  ;;  %v199_v14 = vsel %vm78_vm3, %v194_v1, 0.0 }
  0xa4   :  { %v202_v15 = vsel %vm83_vm4, %v200_v45, 0.0  ;;  %v201_v47 = vsel %vm83_vm4, %v199_v14, 0.0 }
  0xa5   :  { %v192_v48 = vadd.f32 %v190_v22, %v188_v41  ;;  %v204_v49 = vmul.f32 0.20430963, %v202_v15  ;;  %v191_v50 = vadd.f32 %v189_v23, %v187_v44  ;;  %v203_v51 = vmul.f32 0.20430963, %v201_v47 }
  0xa6   :  { %v210_v0 = vpop.permute.xlu1 %209  ;;  %v208_v52 = vpop.permute.xlu0 %207  ;;  %v261_v23 = vmul.f32 -0.25226825, %v1110_v18 }
  0xa7   :  { %v214_v53 = vsel %vm55_vm2, 0.0, %v210_v0  ;;  %v213_v54 = vsel %vm55_vm2, 0.0, %v208_v52  ;;  %v206_v59 = vadd.f32 %v204_v49, %v192_v48  ;;  %v205_v60 = vadd.f32 %v203_v51, %v191_v50 }
  0xa8   :  { %v216_v55 = vsel %vm59_vm5, %v214_v53, 0.0  ;;  %v215_v56 = vsel %vm59_vm5, %v213_v54, 0.0  ;;  %v305_v54 = vmul.f32 -0.4151341, %v1130_v24 }
  0xa9   :  { %v218_v61 = vmul.f32 -0.27575096, %v216_v55  ;;  %v217_v62 = vmul.f32 -0.27575096, %v215_v56  ;;  %v304_v55 = vmul.f32 -0.4151341, %v1133_v25 }
  0xaa   :  { %v228_v63 = vpop.permute.xlu1 %227  ;;  %v226_v9 = vpop.permute.xlu0 %225 }
  0xab   :  { %v220_v2 = vadd.f32 %v218_v61, %v206_v59  ;;  %v219_v3 = vadd.f32 %v217_v62, %v205_v60  ;;  %v232_v4 = vsel %vm78_vm3, %v228_v63, 0.0  ;;  %v231_v5 = vsel %vm78_vm3, %v226_v9, 0.0 }
  0xac   :  { %v234_v6 = vsel %vm83_vm4, %v232_v4, 0.0  ;;  %v233_v11 = vsel %vm83_vm4, %v231_v5, 0.0 }
  0xad   :  { %v224_v7 = vadd.f32 %v222_v57, %v220_v2  ;;  %v236_v10 = vmul.f32 -0.079052076, %v234_v6  ;;  %v223_v8 = vadd.f32 %v221_v58, %v219_v3  ;;  %v235_v12 = vmul.f32 -0.079052076, %v233_v11 }
  0xae   :  { %v249_v13 = vpop.permute.xlu1 %248  ;;  %v247_v16 = vpop.permute.xlu0 %246 }
  0xaf   :  { %v253_v17 = vsel %vm55_vm2, 0.0, %v249_v13  ;;  %v252_v22 = vsel %vm55_vm2, 0.0, %v247_v16  ;;  %v238_v33 = vadd.f32 %v236_v10, %v224_v7  ;;  %v237_v36 = vadd.f32 %v235_v12, %v223_v8 }
  0xb0   :  { %v255_v27 = vsel %vm59_vm5, %v253_v17, 0.0  ;;  %v254_v32 = vsel %vm59_vm5, %v252_v22, 0.0  ;;  %v337_v22 = vmul.f32 0.28194582, %v1117_v21 }
  0xb1   :  { %v257_v37 = vmul.f32 0.09384363, %v255_v27  ;;  %v256_v40 = vmul.f32 0.09384363, %v254_v32 }
  0xb2   :  { %v267_v1 = vpop.permute.xlu1 %266  ;;  %v265_v41 = vpop.permute.xlu0 %264 }
  0xb3   :  { %v259_v44 = vadd.f32 %v257_v37, %v238_v33  ;;  %v258_v45 = vadd.f32 %v256_v40, %v237_v36  ;;  %v271_v14 = vsel %vm78_vm3, %v267_v1, 0.0  ;;  %v270_v18 = vsel %vm78_vm3, %v265_v41, 0.0 }
  0xb4   :  { %v273_v19 = vsel %vm83_vm4, %v271_v14, 0.0  ;;  %v272_v15 = vsel %vm83_vm4, %v270_v18, 0.0 }
  0xb5   :  { %v263_v47 = vadd.f32 %v261_v23, %v259_v44  ;;  %v275_v48 = vmul.f32 -0.014677816, %v273_v19  ;;  %v262_v49 = vadd.f32 %v260_v26, %v258_v45  ;;  %v274_v50 = vmul.f32 -0.014677816, %v272_v15 }
  0xb6   :  { %v293_v51 = vpop.permute.xlu1 %292  ;;  %v291_v0 = vpop.permute.xlu0 %290  ;;  %v336_v23 = vmul.f32 0.28194582, %v1115_v20 }
  0xb7   :  { %v297_v52 = vsel %vm55_vm2, 0.0, %v293_v51  ;;  %v296_v53 = vsel %vm55_vm2, 0.0, %v291_v0  ;;  %v277_v58 = vadd.f32 %v275_v48, %v263_v47  ;;  %v276_v59 = vadd.f32 %v274_v50, %v262_v49 }
  0xb8   :  { %v299_v56 = vsel %vm59_vm5, %v297_v52, 0.0  ;;  %v298_v57 = vsel %vm59_vm5, %v296_v53, 0.0  ;;  %v376_v50 = vmul.f32 -0.11513281, %v1154_v28  ;;  %v375_v51 = vmul.f32 -0.11513281, %v1157_v29 }
  0xb9   :  { %v301_v60 = vmul.f32 -0.20262404, %v299_v56  ;;  %v300_v61 = vmul.f32 -0.20262404, %v298_v57 }
  0xba   :  { %v311_v62 = vpop.permute.xlu1 %310  ;;  %v309_v63 = vpop.permute.xlu0 %308 }
  0xbb   :  { %v303_v9 = vadd.f32 %v301_v60, %v277_v58  ;;  %v302_v2 = vadd.f32 %v300_v61, %v276_v59  ;;  %v315_v3 = vsel %vm78_vm3, %v311_v62, 0.0  ;;  %v314_v24 = vsel %vm78_vm3, %v309_v63, 0.0 }
  0xbc   :  { %v317_v25 = vsel %vm83_vm4, %v315_v3, 0.0  ;;  %v316_v4 = vsel %vm83_vm4, %v314_v24, 0.0 }
  0xbd   :  { %v307_v5 = vadd.f32 %v305_v54, %v303_v9  ;;  %v319_v6 = vmul.f32 -0.23440087, %v317_v25  ;;  %v306_v11 = vadd.f32 %v304_v55, %v302_v2  ;;  %v318_v7 = vmul.f32 -0.23440087, %v316_v4 }
  0xbe   :  { %v325_v10 = vpop.permute.xlu1 %324  ;;  %v323_v8 = vpop.permute.xlu0 %322 }
  0xbf   :  { %v329_v12 = vsel %vm55_vm2, 0.0, %v325_v10  ;;  %v328_v13 = vsel %vm55_vm2, 0.0, %v323_v8  ;;  %v321_v26 = vadd.f32 %v319_v6, %v307_v5  ;;  %v320_v27 = vadd.f32 %v318_v7, %v306_v11 }
  0xc0   :  { %v331_v16 = vsel %vm59_vm5, %v329_v12, 0.0  ;;  %v330_v17 = vsel %vm59_vm5, %v328_v13, 0.0  ;;  %v420_v6 = vmul.f32 -0.08674781, %v1174_v34  ;;  %v419_v11 = vmul.f32 -0.08674781, %v1177_v35 }
  0xc1   :  { %v333_v32 = vmul.f32 -0.06824475, %v331_v16  ;;  %v332_v33 = vmul.f32 -0.06824475, %v330_v17 }
  0xc2   :  { %v343_v36 = vpop.permute.xlu1 %342  ;;  %v341_v37 = vpop.permute.xlu0 %340 }
  0xc3   :  { %v335_v40 = vadd.f32 %v333_v32, %v321_v26  ;;  %v334_v1 = vadd.f32 %v332_v33, %v320_v27  ;;  %v347_v41 = vsel %vm78_vm3, %v343_v36, 0.0  ;;  %v346_v44 = vsel %vm78_vm3, %v341_v37, 0.0 }
  0xc4   :  { %v349_v45 = vsel %vm83_vm4, %v347_v41, 0.0  ;;  %v348_v21 = vsel %vm83_vm4, %v346_v44, 0.0 }
  0xc5   :  { %v339_v14 = vadd.f32 %v337_v22, %v335_v40  ;;  %v351_v20 = vmul.f32 0.17214286, %v349_v45  ;;  %v338_v18 = vadd.f32 %v336_v23, %v334_v1  ;;  %v350_v19 = vmul.f32 0.17214286, %v348_v21 }
  0xc6   :  { %v364_v15 = vpop.permute.xlu1 %363  ;;  %v362_v47 = vpop.permute.xlu0 %361 }
  0xc7   :  { %v368_v48 = vsel %vm55_vm2, 0.0, %v364_v15  ;;  %v367_v49 = vsel %vm55_vm2, 0.0, %v362_v47  ;;  %v353_v53 = vadd.f32 %v351_v20, %v339_v14  ;;  %v352_v54 = vadd.f32 %v350_v19, %v338_v18 }
  0xc8   :  { %v370_v0 = vsel %vm59_vm5, %v368_v48, 0.0  ;;  %v369_v52 = vsel %vm59_vm5, %v367_v49, 0.0  ;;  %v452_v20 = vmul.f32 -0.37461853, %v1161_v31  ;;  %v451_v18 = vmul.f32 -0.37461853, %v1159_v30 }
  0xc9   :  { %v372_v55 = vmul.f32 -0.24559738, %v370_v0  ;;  %v371_v56 = vmul.f32 -0.24559738, %v369_v52 }
  0xca   :  { %v382_v57 = vpop.permute.xlu1 %381  ;;  %v380_v58 = vpop.permute.xlu0 %379 }
  0xcb   :  { %v374_v59 = vadd.f32 %v372_v55, %v353_v53  ;;  %v373_v60 = vadd.f32 %v371_v56, %v352_v54  ;;  %v386_v61 = vsel %vm78_vm3, %v382_v57, 0.0  ;;  %v385_v28 = vsel %vm78_vm3, %v380_v58, 0.0 }
  0xcc   :  { %v388_v29 = vsel %vm83_vm4, %v386_v61, 0.0  ;;  %v387_v62 = vsel %vm83_vm4, %v385_v28, 0.0  ;;  %v491_v28 = vmul.f32 -0.2752801, %v1198_v38 }
  0xcd   :  { %v378_v63 = vadd.f32 %v376_v50, %v374_v59  ;;  %v390_v9 = vmul.f32 0.17120898, %v388_v29  ;;  %v377_v2 = vadd.f32 %v375_v51, %v373_v60  ;;  %v389_v3 = vmul.f32 0.17120898, %v387_v62 }
  0xce   :  { %v408_v24 = vpop.permute.xlu1 %407  ;;  %v406_v25 = vpop.permute.xlu0 %405  ;;  %v490_v29 = vmul.f32 -0.2752801, %v1201_v39 }
  0xcf   :  { %v412_v4 = vsel %vm55_vm2, 0.0, %v408_v24  ;;  %v411_v5 = vsel %vm55_vm2, 0.0, %v406_v25  ;;  %v392_v8 = vadd.f32 %v390_v9, %v378_v63  ;;  %v391_v12 = vadd.f32 %v389_v3, %v377_v2 }
  0xd0   :  { %v414_v7 = vsel %vm59_vm5, %v412_v4, 0.0  ;;  %v413_v10 = vsel %vm59_vm5, %v411_v5, 0.0 }
  0xd1   :  { %v416_v13 = vmul.f32 0.3506715, %v414_v7  ;;  %v415_v16 = vmul.f32 0.3506715, %v413_v10 }
  0xd2   :  { %v426_v17 = vpop.permute.xlu1 %425  ;;  %v424_v22 = vpop.permute.xlu0 %423 }
  0xd3   :  { %v418_v23 = vadd.f32 %v416_v13, %v392_v8  ;;  %v417_v26 = vadd.f32 %v415_v16, %v391_v12  ;;  %v430_v27 = vsel %vm78_vm3, %v426_v17, 0.0  ;;  %v429_v34 = vsel %vm78_vm3, %v424_v22, 0.0 }
  0xd4   :  { %v432_v35 = vsel %vm83_vm4, %v430_v27, 0.0  ;;  %v431_v32 = vsel %vm83_vm4, %v429_v34, 0.0 }
  0xd5   :  { %v422_v33 = vadd.f32 %v420_v6, %v418_v23  ;;  %v434_v36 = vmul.f32 0.011420944, %v432_v35  ;;  %v421_v37 = vadd.f32 %v419_v11, %v417_v26  ;;  %v433_v40 = vmul.f32 0.011420944, %v431_v32 }
  0xd6   :  { %v440_v1 = vpop.permute.xlu1 %439  ;;  %v438_v41 = vpop.permute.xlu0 %437 }
  0xd7   :  { %v444_v44 = vsel %vm55_vm2, 0.0, %v440_v1  ;;  %v443_v45 = vsel %vm55_vm2, 0.0, %v438_v41  ;;  %v436_v19 = vadd.f32 %v434_v36, %v422_v33  ;;  %v435_v15 = vadd.f32 %v433_v40, %v421_v37 }
  0xd8   :  { %v446_v21 = vsel %vm59_vm5, %v444_v44, 0.0  ;;  %v445_v14 = vsel %vm59_vm5, %v443_v45, 0.0 }
  0xd9   :  { %v448_v47 = vmul.f32 -0.13741729, %v446_v21  ;;  %v447_v48 = vmul.f32 -0.13741729, %v445_v14 }
  0xda   :  { %v458_v49 = vpop.permute.xlu1 %457  ;;  %v456_v50 = vpop.permute.xlu0 %455 }
  0xdb   :  { %v450_v51 = vadd.f32 %v448_v47, %v436_v19  ;;  %v449_v0 = vadd.f32 %v447_v48, %v435_v15  ;;  %v462_v52 = vsel %vm78_vm3, %v458_v49, 0.0  ;;  %v461_v53 = vsel %vm78_vm3, %v456_v50, 0.0 }
  0xdc   :  { %v464_v54 = vsel %vm83_vm4, %v462_v52, 0.0  ;;  %v463_v31 = vsel %vm83_vm4, %v461_v53, 0.0 }
  0xdd   :  { %v454_v55 = vadd.f32 %v452_v20, %v450_v51  ;;  %v466_v30 = vmul.f32 -0.04483103, %v464_v54  ;;  %v453_v56 = vadd.f32 %v451_v18, %v449_v0  ;;  %v465_v57 = vmul.f32 -0.04483103, %v463_v31 }
  0xde   :  { %v479_v58 = vpop.permute.xlu1 %478  ;;  %v477_v59 = vpop.permute.xlu0 %476 }
  0xdf   :  { %v483_v60 = vsel %vm55_vm2, 0.0, %v479_v58  ;;  %v482_v61 = vsel %vm55_vm2, 0.0, %v477_v59  ;;  %v468_v9 = vadd.f32 %v466_v30, %v454_v55  ;;  %v467_v2 = vadd.f32 %v465_v57, %v453_v56 }
  0xe0   :  { %v485_v62 = vsel %vm59_vm5, %v483_v60, 0.0  ;;  %v484_v63 = vsel %vm59_vm5, %v482_v61, 0.0 }
  0xe1   :  { %v487_v3 = vmul.f32 0.195497, %v485_v62  ;;  %v486_v24 = vmul.f32 0.195497, %v484_v63 }
  0xe2   :  { %v497_v25 = vpop.permute.xlu1 %496  ;;  %v495_v4 = vpop.permute.xlu0 %494 }
  0xe3   :  { %v489_v5 = vadd.f32 %v487_v3, %v468_v9  ;;  %v488_v6 = vadd.f32 %v486_v24, %v467_v2  ;;  %v501_v11 = vsel %vm78_vm3, %v497_v25, 0.0  ;;  %v500_v38 = vsel %vm78_vm3, %v495_v4, 0.0 }
  0xe4   :  { %v503_v39 = vsel %vm83_vm4, %v501_v11, 0.0  ;;  %v502_v7 = vsel %vm83_vm4, %v500_v38, 0.0 }
  0xe5   :  { %v493_v10 = vadd.f32 %v491_v28, %v489_v5  ;;  %v505_v8 = vmul.f32 -0.15150882, %v503_v39  ;;  %v492_v12 = vadd.f32 %v490_v29, %v488_v6  ;;  %v504_v13 = vmul.f32 -0.15150882, %v502_v7 }
  0xe7   :  { %v507_v16 = vadd.f32 %v505_v8, %v493_v10  ;;  %v506_v17 = vadd.f32 %v504_v13, %v492_v12 }
  0xe9   :  { %v509_v22 = vadd.f32 -0.10114972, %v507_v16  ;;  %v508_v23 = vadd.f32 -0.10114972, %v506_v17 }
  0xeb   :  { %v1389_v26 = vmax.f32 %v509_v22, 0.0  ;;  %v1391_v27 = vmax.f32 %v508_v23, 0.0 }
  0xed   :  { %v515_v34 = vrot.slane %v1391_v27, 6  ;;  %v525_v35 = vrot.slane %v1391_v27, 7  ;;  %v631_v32 = vrot.slane %v1391_v27, 5  ;;  %v516_v33 = vrot.slane %v1389_v26, 6 }
  0xee   :  { %v526_v36 = vrot.slane %v1389_v26, 7  ;;  %v632_v37 = vrot.slane %v1389_v26, 5  ;;  %v709_v41 = vmul.f32 0.64552003, %v1391_v27  ;;  %v710_v18 = vmul.f32 0.64552003, %v1389_v26 }
  0xef   :  { %v520_v40 = vsel %vm514_vm6, 0.0, %v515_v34  ;;  %v636_v1 = vsel %vm630_vm7, 0.0, %v631_v32  ;;  %v517_v45 = vsel %vm514_vm6, %v515_v34, %v516_v33  ;;  %v530_v15 = vsel %vm41_vm0, 0.0, %v525_v35 }
  0xf0   :  { %v701_v44 = vmul.f32 0.15969157, %v636_v1  ;;  %v527_v21 = vsel %vm41_vm0, %v525_v35, %v526_v36  ;;  %v633_v14 = vsel %vm630_vm7, %v631_v32, %v632_v37  ;;  %v521_v48 = vmul.f32 0.54579616, %v520_v40 }
  0xf1   :  { %v702_v20 = vmul.f32 0.15969157, %v633_v14  ;;  %v638_v19 = vmul.f32 0.9264965, %v633_v14  ;;  %v535_v49 = vrot.slane %v1391_v27, 1  ;;  %v536_v52 = vrot.slane %v1389_v26, 1 }
  0xf2   :  { %v705_v47 = vadd.f32 %v701_v44, %v520_v40  ;;  %v637_v51 = vmul.f32 0.9264965, %v636_v1  ;;  %v531_v54 = vadd.f32 %v530_v15, %v521_v48  ;;  %v544_v31 = vrot.slane %v1391_v27, 2 }
  0xf3   :  { %v706_v50 = vadd.f32 %v702_v20, %v517_v45  ;;  %v642_v0 = vadd.f32 %v638_v19, %v517_v45  ;;  %v545_v55 = vrot.slane %v1389_v26, 2  ;;  %v646_v57 = vmul.f32 0.5020741, %v1389_v26 }
  0xf4   :  { %v707_v53 = vadd.f32 %v705_v47, %v530_v15  ;;  %v537_v58 = vsel %vm123_vm1, %v535_v49, %v536_v52  ;;  %v533_v60 = vadd.f32 %v531_v54, %v1391_v27  ;;  %v822_v28 = vmul.f32 0.17249596, %v520_v40 }
  0xf5   :  { %v708_v30 = vadd.f32 %v706_v50, %v527_v21  ;;  %v644_v56 = vadd.f32 %v642_v0, %v527_v21  ;;  %v546_v61 = vsel %vm543_vm8, %v544_v31, %v545_v55  ;;  %v641_v3 = vadd.f32 %v637_v51, %v520_v40 }
  0xf6   :  { %v1409_v59 = vadd.f32 %v709_v41, %v707_v53  ;;  %v550_v63 = vmul.f32 0.34616637, %v546_v61  ;;  %v826_v9 = vadd.f32 %v822_v28, %v530_v15  ;;  %v541_v2 = vadd.f32 %v537_v58, %v533_v60 }
  0xf7   :  { %v1413_v29 = vadd.f32 %v710_v18, %v708_v30  ;;  %v1415_v62 = vadd.f32 %v646_v57, %v644_v56  ;;  %v830_v24 = vmul.f32 0.84542096, %v537_v58  ;;  %v823_v25 = vmul.f32 0.17249596, %v517_v45 }
  0xf8   :  { %715 = vrot.lane.b32.xlu0 %v1409_v59, %s1001_s21  ;;  %v828_v4 = vadd.f32 %v826_v9, %v1391_v27  ;;  %v1422_v5 = vadd.f32 %v550_v63, %v541_v2  ;;  %v540_v6 = vsel %vm123_vm1, %v536_v52, 0.0  ;;  %v522_v11 = vmul.f32 0.54579616, %v517_v45 }
  0xf9   :  { %717 = vrot.lane.b32.xlu1 %v1413_v29, %s1001_s21  ;;  %v827_v38 = vadd.f32 %v823_v25, %v527_v21  ;;  %v549_v10 = vsel %vm543_vm8, %v545_v55, 0.0  ;;  %v831_v12 = vmul.f32 0.84542096, %v540_v6  ;;  %v643_v13 = vadd.f32 %v641_v3, %v530_v15 }
  0xfa   :  { %v832_v39 = vadd.f32 %v830_v24, %v828_v4  ;;  %v532_v7 = vadd.f32 %v527_v21, %v522_v11  ;;  %v645_v22 = vmul.f32 0.5020741, %v1391_v27  ;;  %v551_v23 = vmul.f32 0.34616637, %v549_v10 }
  0xfb   :  { %v829_v8 = vadd.f32 %v827_v38, %v1389_v26  ;;  %v1476_v44 = vadd.s32 4294967294, %v1211_v42  ;;  %v1479_v45 = vadd.s32 4294967293, %v1211_v42  ;;  %v743_v52 = vmul.f32 0.0830011, %v1409_v59 }
  0xfc   :  { %729 = vrot.lane.b32.xlu0 %v1409_v59, %s999_s20  ;;  %v534_v16 = vadd.f32 %v532_v7, %v1389_v26  ;;  %v1437_v35 = vadd.f32 %v645_v22, %v643_v13  ;;  %v744_v55 = vmul.f32 0.0830011, %v1413_v29  ;;  %v770_v63 = vadd.s32 2, %v1211_v42 }
  0xfd   :  { %731 = vrot.lane.b32.xlu1 %v1413_v29, %s999_s20  ;;  %v833_v17 = vadd.f32 %v831_v12, %v829_v8  ;;  %vm585_vm11 = vcmp.ge.s32.totalorder %v1476_v44, 0  ;;  %vm566_vm12 = vcmp.ge.s32.totalorder %v1479_v45, 0  ;;  %vm805_vm1 = vcmask 228352  }
  0xfe   :  { %v542_v34 = vadd.f32 %v540_v6, %v534_v16  ;;  %v693_v56 = vmul.f32 0.045039248, %v1437_v35  ;;  %v789_v16 = vadd.s32 3, %v1211_v42  ;;  %vm772_vm15 = vcmp.lt.s32.totalorder %v770_v63, 16 }
 0x100   :  { %747 = vrot.lane.b32.xlu0 %v1409_v59, %s1000_s0  ;;  %v1439_v32 = vadd.f32 %v551_v23, %v542_v34  ;;  %vm791_vm0 = vcmp.lt.s32.totalorder %v789_v16, 16 }
 0x101   :  { %749 = vrot.lane.b32.xlu1 %v1413_v29, %s1000_s0 }
 0x104   :  { %651 = vrot.lane.b32.xlu0 %v1437_v35, %s1002_s22 }
 0x105   :  { %653 = vrot.lane.b32.xlu1 %v1415_v62, %s1002_s22 }
 0x108   :  { %665 = vrot.lane.b32.xlu0 %v1437_v35, %s1001_s21 }
 0x109   :  { %667 = vrot.lane.b32.xlu1 %v1415_v62, %s1001_s21 }
 0x10c   :  { %761 = vrot.lane.b32.xlu0 %v1409_v59, %s1003_s23 }
 0x10d   :  { %763 = vrot.lane.b32.xlu1 %v1413_v29, %s1003_s23 }
 0x110   :  { %679 = vrot.lane.b32.xlu0 %v1437_v35, %s999_s20 }
 0x111   :  { %681 = vrot.lane.b32.xlu1 %v1415_v62, %s999_s20 }
 0x114   :  { %780 = vrot.lane.b32.xlu0 %v1409_v59, %s1004_s24 }
 0x115   :  { %782 = vrot.lane.b32.xlu1 %v1413_v29, %s1004_s24 }
 0x118   :  { %836 = vrot.lane.b32.xlu0 %v832_v39, %s1002_s22 }
 0x119   :  { %838 = vrot.lane.b32.xlu1 %v833_v17, %s1002_s22 }
 0x11c   :  { %850 = vrot.lane.b32.xlu0 %v832_v39, %s1001_s21 }
 0x11d   :  { %852 = vrot.lane.b32.xlu1 %v833_v17, %s1001_s21 }
 0x120   :  { %799 = vrot.lane.b32.xlu0 %v1409_v59, %s1005_s25 }
 0x121   :  { %801 = vrot.lane.b32.xlu1 %v1413_v29, %s1005_s25 }
 0x124   :  { %864 = vrot.lane.b32.xlu0 %v832_v39, %s999_s20 }
 0x125   :  { %866 = vrot.lane.b32.xlu1 %v833_v17, %s999_s20 }
 0x128   :  { %556 = vrot.lane.b32.xlu0 %v1422_v5, %s1002_s22 }
 0x129   :  { %558 = vrot.lane.b32.xlu1 %v1439_v32, %s1002_s22 }
 0x12c   :  { %575 = vrot.lane.b32.xlu0 %v1422_v5, %s1001_s21 }
 0x12d   :  { %577 = vrot.lane.b32.xlu1 %v1439_v32, %s1001_s21 }
 0x130   :  { %594 = vrot.lane.b32.xlu0 %v1422_v5, %s999_s20 }
 0x131   :  { %596 = vrot.lane.b32.xlu1 %v1439_v32, %s999_s20 }
 0x134   :  { %612 = vrot.lane.b32.xlu0 %v1422_v5, %s1000_s0 }
 0x135   :  { %614 = vrot.lane.b32.xlu1 %v1439_v32, %s1000_s0 }
 0x16a   :  { %v716_v26 = vpop.permute.xlu0 %715 }
 0x16b   :  { %v718_v27 = vpop.permute.xlu1 %717  ;;  %v721_v18 = vsel %vm581_vm9, 0.0, %v716_v26 }
 0x16c   :  { %v723_v51 = vsel %vm585_vm11, %v721_v18, 0.0  ;;  %v722_v57 = vsel %vm581_vm9, 0.0, %v718_v27 }
 0x16d   :  { %v725_v60 = vmul.f32 0.011008208, %v723_v51  ;;  %v724_v25 = vsel %vm585_vm11, %v722_v57, 0.0 }
 0x16e   :  { %v730_v33 = vpop.permute.xlu0 %729  ;;  %v726_v22 = vmul.f32 0.011008208, %v724_v25 }
 0x16f   :  { %v732_v36 = vpop.permute.xlu1 %731  ;;  %v735_v15 = vsel %vm55_vm2, 0.0, %v730_v33 }
 0x170   :  { %v736_v0 = vsel %vm55_vm2, 0.0, %v732_v36  ;;  %v737_v31 = vsel %vm59_vm5, %v735_v15, 0.0  ;;  %v694_v36 = vmul.f32 0.045039248, %v1415_v62 }
 0x171   :  { %v738_v61 = vsel %vm59_vm5, %v736_v0, 0.0  ;;  %v739_v9 = vmul.f32 0.0830011, %v737_v31 }
 0x172   :  { %v748_v37 = vpop.permute.xlu0 %747  ;;  %v740_v38 = vmul.f32 0.0830011, %v738_v61 }
 0x173   :  { %v750_v40 = vpop.permute.xlu1 %749  ;;  %v753_v8 = vsel %vm78_vm3, %v748_v37, 0.0  ;;  %v741_v23 = vadd.f32 %v739_v9, %v725_v60 }
 0x174   :  { %v754_v34 = vsel %vm78_vm3, %v750_v40, 0.0  ;;  %v755_v37 = vsel %vm83_vm4, %v753_v8, 0.0 }
 0x176   :  { %v652_v1 = vpop.permute.xlu0 %651 }
 0x177   :  { %v654_v41 = vpop.permute.xlu1 %653  ;;  %v657_v47 = vsel %vm562_vm10, 0.0, %v652_v1  ;;  %v742_v1 = vadd.f32 %v740_v38, %v726_v22 }
 0x178   :  { %v658_v48 = vsel %vm562_vm10, 0.0, %v654_v41  ;;  %v659_v30 = vsel %vm566_vm12, %v657_v47, 0.0 }
 0x179   :  { %v660_v58 = vsel %vm566_vm12, %v658_v48, 0.0  ;;  %v661_v2 = vmul.f32 0.09964738, %v659_v30  ;;  %v808_v48 = vadd.s32 4, %v1211_v42 }
 0x17a   :  { %v666_v21 = vpop.permute.xlu0 %665  ;;  %v662_v4 = vmul.f32 0.09964738, %v660_v58 }
 0x17b   :  { %v671_v14 = vsel %vm581_vm9, 0.0, %v666_v21  ;;  %v668_v20 = vpop.permute.xlu1 %667  ;;  %vm810_vm6 = vcmp.lt.s32.totalorder %v808_v48, 16 }
 0x17c   :  { %v672_v19 = vsel %vm581_vm9, 0.0, %v668_v20  ;;  %v673_v49 = vsel %vm585_vm11, %v671_v14, 0.0  ;;  %v756_v14 = vsel %vm83_vm4, %v754_v34, 0.0 }
 0x17d   :  { %v674_v53 = vsel %vm585_vm11, %v672_v19, 0.0  ;;  %v675_v59 = vmul.f32 0.11077876, %v673_v49  ;;  %v745_v19 = vadd.f32 %v743_v52, %v741_v23  ;;  %v757_v49 = vmul.f32 0.0830011, %v755_v37 }
 0x17e   :  { %v762_v50 = vpop.permute.xlu0 %761  ;;  %v676_v28 = vmul.f32 0.11077876, %v674_v53  ;;  %v746_v53 = vadd.f32 %v744_v55, %v742_v1 }
 0x17f   :  { %v764_v54 = vpop.permute.xlu1 %763  ;;  %v677_v39 = vadd.f32 %v675_v59, %v661_v2  ;;  %v768_v27 = vsel %vm767_vm13, %v762_v50, 0.0  ;;  %v759_v61 = vadd.f32 %v757_v49, %v745_v19 }
 0x180   :  { %v678_v12 = vadd.f32 %v676_v28, %v662_v4  ;;  %v769_v41 = vsel %vm767_vm13, %v764_v54, 0.0  ;;  %v774_v15 = vsel %vm772_vm15, %v768_v27, 0.0  ;;  %v758_v54 = vmul.f32 0.0830011, %v756_v14 }
 0x181   :  { %v775_v50 = vsel %vm772_vm15, %v769_v41, 0.0 }
 0x182   :  { %v680_v29 = vpop.permute.xlu0 %679  ;;  %v777_v58 = vmul.f32 0.0830011, %v775_v50  ;;  %v760_v55 = vadd.f32 %v758_v54, %v746_v53 }
 0x183   :  { %v685_v3 = vsel %vm55_vm2, 0.0, %v680_v29  ;;  %v682_v24 = vpop.permute.xlu1 %681 }
 0x184   :  { %v687_v6 = vsel %vm59_vm5, %v685_v3, 0.0  ;;  %v686_v11 = vsel %vm55_vm2, 0.0, %v682_v24  ;;  %v779_v4 = vadd.f32 %v777_v58, %v760_v55 }
 0x185   :  { %v689_v7 = vmul.f32 0.11077876, %v687_v6  ;;  %v688_v10 = vsel %vm59_vm5, %v686_v11, 0.0 }
 0x186   :  { %v690_v13 = vmul.f32 0.11077876, %v688_v10  ;;  %v781_v17 = vpop.permute.xlu0 %780 }
 0x187   :  { %v691_v35 = vadd.f32 %v689_v7, %v677_v39  ;;  %v783_v26 = vpop.permute.xlu1 %782  ;;  %v787_v40 = vsel %vm786_vm14, %v781_v17, 0.0 }
 0x188   :  { %v692_v33 = vadd.f32 %v690_v13, %v678_v12  ;;  %v788_v51 = vsel %vm786_vm14, %v783_v26, 0.0  ;;  %v793_v31 = vsel %vm791_vm0, %v787_v40, 0.0 }
 0x189   :  { %v695_v21 = vadd.f32 %v693_v56, %v691_v35  ;;  %v776_v56 = vmul.f32 0.0830011, %v774_v15  ;;  %v794_v59 = vsel %vm791_vm0, %v788_v51, 0.0  ;;  %v795_v28 = vmul.f32 0.0830011, %v793_v31 }
 0x18a   :  { %v837_v20 = vpop.permute.xlu0 %836  ;;  %v696_v18 = vadd.f32 %v694_v36, %v692_v33  ;;  %v796_v2 = vmul.f32 0.0830011, %v794_v59 }
 0x18b   :  { %v839_v47 = vpop.permute.xlu1 %838  ;;  %v697_v62 = vadd.f32 -0.14915678, %v695_v21  ;;  %v842_v29 = vsel %vm562_vm10, 0.0, %v837_v20  ;;  %v778_v9 = vadd.f32 %v776_v56, %v759_v61 }
 0x18c   :  { %v698_v0 = vadd.f32 -0.14915678, %v696_v18  ;;  %v843_v3 = vsel %vm562_vm10, 0.0, %v839_v47  ;;  %v844_v7 = vsel %vm566_vm12, %v842_v29, 0.0  ;;  %v798_v22 = vadd.f32 %v796_v2, %v779_v4 }
 0x18d   :  { %v699_v30 = vmax.f32 %v697_v62, 0.0  ;;  %v797_v39 = vadd.f32 %v795_v28, %v778_v9  ;;  %v845_v12 = vsel %vm566_vm12, %v843_v3, 0.0  ;;  %v846_v26 = vmul.f32 0.09008464, %v844_v7 }
 0x18e   :  { %v851_v57 = vpop.permute.xlu0 %850  ;;  %v700_v52 = vmax.f32 %v698_v0, 0.0  ;;  %v847_v1 = vmul.f32 0.09008464, %v845_v12  ;;  %v609_v12 = vmul.f32 0.07461401, %v1439_v32 }
 0x18f   :  { %v856_v60 = vsel %vm581_vm9, 0.0, %v851_v57  ;;  %v853_v42 = vpop.permute.xlu1 %852  ;;  %884 = vrot.lane.b32.xlu0 %v699_v30, %s1006_s26 }
 0x190   :  { %v857_v63 = vsel %vm581_vm9, 0.0, %v853_v42  ;;  %886 = vrot.lane.b32.xlu1 %v700_v52, %s1006_s26  ;;  %v858_v24 = vsel %vm585_vm11, %v856_v60, 0.0 }
 0x191   :  { %v859_v6 = vsel %vm585_vm11, %v857_v63, 0.0  ;;  %v860_v13 = vmul.f32 0.095952556, %v858_v24 }
 0x192   :  { %v800_v25 = vpop.permute.xlu0 %799  ;;  %v861_v23 = vmul.f32 0.095952556, %v859_v6 }
 0x193   :  { %v806_v11 = vsel %vm805_vm1, %v800_v25, 0.0  ;;  %v802_v38 = vpop.permute.xlu1 %801  ;;  %v862_v14 = vadd.f32 %v860_v13, %v846_v26 }
 0x194   :  { %v812_v10 = vsel %vm810_vm6, %v806_v11, 0.0  ;;  %v807_v8 = vsel %vm805_vm1, %v802_v38, 0.0  ;;  %v863_v19 = vadd.f32 %v861_v23, %v847_v1 }
 0x195   :  { %v814_v16 = vmul.f32 0.0034258526, %v812_v10  ;;  %v813_v17 = vsel %vm810_vm6, %v807_v8, 0.0  ;;  %v608_v10 = vmul.f32 0.07461401, %v1422_v5 }
 0x196   :  { %v815_v34 = vmul.f32 0.0034258526, %v813_v17  ;;  %v865_v35 = vpop.permute.xlu0 %864 }
 0x197   :  { %v816_v27 = vadd.f32 %v814_v16, %v797_v39  ;;  %v870_v33 = vsel %vm55_vm2, 0.0, %v865_v35  ;;  %v867_v36 = vpop.permute.xlu1 %866 }
 0x198   :  { %v817_v37 = vadd.f32 %v815_v34, %v798_v22  ;;  %v872_v41 = vsel %vm59_vm5, %v870_v33, 0.0  ;;  %v871_v21 = vsel %vm55_vm2, 0.0, %v867_v36 }
 0x199   :  { %v818_v40 = vadd.f32 0.15848024, %v816_v27  ;;  %v874_v20 = vmul.f32 0.091543555, %v872_v41  ;;  %v873_v18 = vsel %vm59_vm5, %v871_v21, 0.0 }
 0x19a   :  { %v819_v15 = vadd.f32 0.15848024, %v817_v37  ;;  %v875_v47 = vmul.f32 0.091543555, %v873_v18  ;;  %v557_v62 = vpop.permute.xlu0 %556 }
 0x19b   :  { %v876_v48 = vadd.f32 %v874_v20, %v862_v14  ;;  %v563_v49 = vsel %vm562_vm10, 0.0, %v557_v62  ;;  %v559_v50 = vpop.permute.xlu1 %558  ;;  %v820_v51 = vmax.f32 %v818_v40, 0.0 }
 0x19c   :  { %v877_v0 = vadd.f32 %v875_v47, %v863_v19  ;;  %v569_v53 = vsel %vm566_vm12, %v563_v49, 0.0  ;;  %v564_v54 = vsel %vm562_vm10, 0.0, %v559_v50  ;;  %v821_v31 = vmax.f32 %v819_v15, 0.0 }
 0x19d   :  { %v878_v30 = vadd.f32 -0.018473746, %v876_v48  ;;  %v570_v56 = vsel %vm566_vm12, %v564_v54, 0.0  ;;  %892 = vrot.lane.b32.xlu0 %v820_v51, %s1007_s27  ;;  %v571_v63 = vmul.f32 0.017977612, %v569_v53 }
 0x19e   :  { %v879_v57 = vadd.f32 -0.018473746, %v877_v0  ;;  %894 = vrot.lane.b32.xlu1 %v821_v31, %s1007_s27  ;;  %v576_v52 = vpop.permute.xlu0 %575  ;;  %v572_v29 = vmul.f32 0.017977612, %v570_v56 }
 0x19f   :  { %v582_v58 = vsel %vm581_vm9, 0.0, %v576_v52  ;;  %v578_v59 = vpop.permute.xlu1 %577  ;;  %v880_v60 = vmax.f32 %v878_v30, 0.0 }
 0x1a0   :  { %v588_v42 = vsel %vm585_vm11, %v582_v58, 0.0  ;;  %v583_v61 = vsel %vm581_vm9, 0.0, %v578_v59  ;;  %v881_v28 = vmax.f32 %v879_v57, 0.0 }
 0x1a1   :  { %v590_v55 = vmul.f32 0.07461401, %v588_v42  ;;  %v589_v45 = vsel %vm585_vm11, %v583_v61, 0.0  ;;  %900 = vrot.lane.b32.xlu0 %v880_v60, %s1008_s28 }
 0x1a2   :  { %v591_v9 = vmul.f32 0.07461401, %v589_v45  ;;  %902 = vrot.lane.b32.xlu1 %v881_v28, %s1008_s28  ;;  %v595_v2 = vpop.permute.xlu0 %594 }
 0x1a3   :  { %v592_v3 = vadd.f32 %v590_v55, %v571_v63  ;;  %v600_v24 = vsel %vm55_vm2, 0.0, %v595_v2  ;;  %v597_v25 = vpop.permute.xlu1 %596 }
 0x1a4   :  { %v593_v4 = vadd.f32 %v591_v9, %v572_v29  ;;  %v602_v6 = vsel %vm59_vm5, %v600_v24, 0.0  ;;  %v601_v11 = vsel %vm55_vm2, 0.0, %v597_v25  ;;  %vm906_vm2 = vcmask 261120  }
 0x1a5   :  { %v604_v38 = vmul.f32 0.07461401, %v602_v6  ;;  %v603_v44 = vsel %vm59_vm5, %v601_v11, 0.0  ;;  %vm909_vm5 = vcmask 523264  }
 0x1a6   :  { %v605_v39 = vmul.f32 0.07461401, %v603_v44  ;;  %v613_v17 = vpop.permute.xlu0 %612 }
 0x1a7   :  { %v606_v7 = vadd.f32 %v604_v38, %v592_v3  ;;  %v615_v22 = vpop.permute.xlu1 %614  ;;  %v618_v23 = vsel %vm78_vm3, %v613_v17, 0.0 }
 0x1a8   :  { %v607_v8 = vadd.f32 %v605_v39, %v593_v4  ;;  %v619_v34 = vsel %vm78_vm3, %v615_v22, 0.0  ;;  %v620_v35 = vsel %vm83_vm4, %v618_v23, 0.0  ;;  %vm912_vm3 = vcmask 785408  }
 0x1a9   :  { %v610_v13 = vadd.f32 %v608_v10, %v606_v7  ;;  %v621_v46 = vsel %vm83_vm4, %v619_v34, 0.0  ;;  %v622_v26 = vmul.f32 0.023460714, %v620_v35 }
 0x1aa   :  { %v611_v16 = vadd.f32 %v609_v12, %v607_v8  ;;  %v623_v27 = vmul.f32 0.023460714, %v621_v46 }
 0x1ab   :  { %v624_v5 = vadd.f32 %v622_v26, %v610_v13 }
 0x1ac   :  { %v625_v33 = vadd.f32 %v623_v27, %v611_v16 }
 0x1ad   :  { %v626_v32 = vadd.f32 -0.097830355, %v624_v5 }
 0x1ae   :  { %v627_v37 = vadd.f32 -0.097830355, %v625_v33 }
 0x1af   :  { %v628_v21 = vmax.f32 %v626_v32, 0.0 }
 0x1b0   :  { %v629_v40 = vmax.f32 %v627_v37, 0.0 }
 0x201   :  { %v885_v36 = vpop.permute.xlu0 %884 }
 0x202   :  { %v887_v1 = vpop.permute.xlu1 %886  ;;  %v907_v20 = vsel %vm906_vm2, %v628_v21, %v885_v36 }
 0x203   :  { %v908_v43 = vsel %vm906_vm2, %v629_v40, %v887_v1 }
 0x20f   :  { %v893_v41 = vpop.permute.xlu0 %892 }
 0x210   :  { %v895_v14 = vpop.permute.xlu1 %894  ;;  %v910_v18 = vsel %vm909_vm5, %v907_v20, %v893_v41 }
 0x211   :  { %v911_v15 = vsel %vm909_vm5, %v908_v43, %v895_v14 }
 0x213   :  { %v901_v19 = vpop.permute.xlu0 %900 }
 0x214   :  { %v913_v47 = vsel %vm912_vm3, %v910_v18, %v901_v19  ;;  %v903_v62 = vpop.permute.xlu1 %902 }
 0x215   :  { %915 = vst [vmem:[#allocation5] sm:$0xff] %v913_v47  ;;  %v914_v48 = vsel %vm912_vm3, %v911_v15, %v903_v62 }
 0x216   :  { %916 = vst [vmem:[#allocation5 + $0x8] sm:$0xff] %v914_v48 }
 0x217   :  { %981 = shalt.err (!%p978_p12)
}
 0x218   :  { %s982_s5 = scalar_lea.hbm %s1598_s1, 256 }
 0x219   :  { %p983_p13 = scmp.ne.s32.totalorder %s1598_s1, %s982_s5  ;;  %p986_p0 = scmp.lt.u32.totalorder %s982_s5, %s1598_s1 }
 0x21b   :  { %p988_p1 = pnand %p986_p0, %p983_p13 }
 0x21d   :  { %991 = shalt.err (!%p988_p1)
}
 0x21e   :  { %928 = dma.vmem_to_hbm [thread:$0]  %s923_s30, 256, %s1598_s1, [#allocation4], %s997_s16, %s997_s16, %s998_s17  }
 0x21f   :  { %994 = dma.done.wait [#allocation4], 256  }
 0x220   :  { %995 = vsyncadd [#allocation4], 4294967040 }
 0x221   :  { %932 = vsyncpa [#allocation3], 1 }
 0x222   :  { %933 = vsyncpa [#allocation4], 1 }

</bundles_post_ra>
